<compile_context>
chip_gen: v7x
topology: tpu7x:2x2x1
jax: 0.10.0
libtpu: 0.0.40
codegen_flags: <defaults>
</compile_context>

<pallas_src>
import jax
import jax.numpy as jnp
from jax.experimental import pallas as pl
from jax.experimental.pallas import tpu as pltpu

HIDDEN = 256  # per-head hidden width (PyTorch module uses 256)


def critic_kernel(s_ref, a_ref, ws_ref, wa_ref, w25_ref, slab_ref,
                  q1_ref, q2_ref):
    """One batch tile of the twin-Q forward pass.

    s_ref:   (TB, S)   activations (native dtype; cast to bf16 here)
    a_ref:   (TB, A)
    ws_ref:  (S, 2H)   bf16, layer-1 weights (state rows), heads fused on lanes
    wa_ref:  (A, 2H)   bf16, layer-1 weights (action rows)
    w25_ref: (2H, H)   bf16, rows [0:H) = fc2, rows [H:2H) = fc5
    slab_ref:(4, 2H)   f32:  row0=[b1|b4] row1=[b2|b5] row2=[w3|w6] row3=[b3,b6,..]
    q1_ref:  (TB, 1)   f32 output head 1
    q2_ref:  (TB, 1)   f32 output head 2
    """
    H = HIDDEN
    s = s_ref[...].astype(jnp.bfloat16)            # (TB, S)
    a = a_ref[...].astype(jnp.bfloat16)            # (TB, A)
    slab = slab_ref[...]                           # (4, 2H) f32

    # ---- Layer 1, both heads fused along lanes: (TB, 2H) --------------------
    # x @ [w1 | w4] computed as state-part + action-part (no concat needed).
    h = (jnp.dot(s, ws_ref[...], preferred_element_type=jnp.float32)
         + jnp.dot(a, wa_ref[...], preferred_element_type=jnp.float32)
         + slab[0:1, :])
    h = jnp.maximum(h, 0.0)                        # f32 epilogue (v5e-friendly)

    # ---- Layer 2, per head: (TB, H) each -------------------------------------
    h1 = h[:, :H].astype(jnp.bfloat16)
    h2 = h[:, H:].astype(jnp.bfloat16)
    g1 = jnp.dot(h1, w25_ref[:H, :], preferred_element_type=jnp.float32)
    g2 = jnp.dot(h2, w25_ref[H:, :], preferred_element_type=jnp.float32)
    g1 = jnp.maximum(g1 + slab[1:2, :H], 0.0)
    g2 = jnp.maximum(g2 + slab[1:2, H:], 0.0)

    # ---- Output layer: VPU multiply + lane reduction (kept in f32) -----------
    # q1 = g1 @ w3 + b3 ; q2 = g2 @ w6 + b6, without touching the MXU.
    q1_ref[...] = (jnp.sum(g1 * slab[2:3, :H], axis=-1, keepdims=True)
                   + slab[3:4, 0:1])
    q2_ref[...] = (jnp.sum(g2 * slab[2:3, H:], axis=-1, keepdims=True)
                   + slab[3:4, 1:2])


def pack_critic_params(params, state_dim):
    """One-time packing/casting of the 12 (in, out)-oriented params into 4 buffers.

    NOTE: real torch nn.Linear.weight is (out, in); transpose before packing if
    loading an actual checkpoint.
    """
    S, H = state_dim, HIDDEN
    w1, w4 = params["w1"], params["w4"]
    # Layer 1 fused along output lanes, split by input (state vs action) rows.
    ws = jnp.concatenate([w1[:S], w4[:S]], axis=1).astype(jnp.bfloat16)   # (S, 2H)
    wa = jnp.concatenate([w1[S:], w4[S:]], axis=1).astype(jnp.bfloat16)   # (A, 2H)
    # Layer 2 weights row-stacked: rows [0:H) = fc2, rows [H:2H) = fc5.
    w25 = jnp.concatenate([params["w2"], params["w5"]],
                          axis=0).astype(jnp.bfloat16)                    # (2H, H)
    # f32 slab: biases + output-layer weight rows (stay f32 on the VPU path).
    slab = jnp.zeros((4, 2 * H), jnp.float32)
    slab = slab.at[0, :].set(jnp.concatenate([params["b1"][0], params["b4"][0]]))
    slab = slab.at[1, :].set(jnp.concatenate([params["b2"][0], params["b5"][0]]))
    slab = slab.at[2, :].set(jnp.concatenate([params["w3"][:, 0], params["w6"][:, 0]]))
    slab = slab.at[3, 0].set(params["b3"][0, 0])
    slab = slab.at[3, 1].set(params["b6"][0, 0])
    return {"ws": ws, "wa": wa, "w25": w25, "slab": slab}


def critic_forward(state, action, packed, *, block_b=128):
    """state: (B, S), action: (B, A), packed params -> (q1, q2), each (B, 1) f32."""
    B, S = state.shape
    A = action.shape[1]
    H = HIDDEN
    if B < block_b or B % block_b != 0:
        block_b = B  # fall back to a single batch tile for small/ragged batches
    grid = (pl.cdiv(B, block_b),)

    # Activation tiles stream over the batch grid; weight slabs are resident
    # (constant index_map -> DMA'd into VMEM once per call).
    in_specs = [
        pl.BlockSpec((block_b, S), lambda i: (i, 0)),
        pl.BlockSpec((block_b, A), lambda i: (i, 0)),
        pl.BlockSpec((S, 2 * H), lambda i: (0, 0)),
        pl.BlockSpec((A, 2 * H), lambda i: (0, 0)),
        pl.BlockSpec((2 * H, H), lambda i: (0, 0)),
        pl.BlockSpec((4, 2 * H), lambda i: (0, 0)),
    ]
    out_specs = (
        pl.BlockSpec((block_b, 1), lambda i: (i, 0)),
        pl.BlockSpec((block_b, 1), lambda i: (i, 0)),
    )
    q1, q2 = pl.pallas_call(
        critic_kernel,
        grid=grid,
        in_specs=in_specs,
        out_specs=out_specs,
        out_shape=(jax.ShapeDtypeStruct((B, 1), jnp.float32),
                   jax.ShapeDtypeStruct((B, 1), jnp.float32)),
        compiler_params=pltpu.CompilerParams(
            dimension_semantics=("parallel",)),   # v7x: shard batch over 2 TCs
    )(state, action, packed["ws"], packed["wa"], packed["w25"], packed["slab"])
    return q1, q2


def init_critic_params(key, state_dim, action_dim, hidden=HIDDEN):
    """Deterministic PyTorch-Linear-style uniform init (no checkpoint load)."""
    in_dim = state_dim + action_dim
    dims = [(in_dim, hidden), (hidden, hidden), (hidden, 1),
            (in_dim, hidden), (hidden, hidden), (hidden, 1)]
    params = {}
    keys = jax.random.split(key, 2 * len(dims))
    for i, (fan_in, fan_out) in enumerate(dims):
        bound = 1.0 / (fan_in ** 0.5)
        params[f"w{i + 1}"] = jax.random.uniform(
            keys[2 * i], (fan_in, fan_out), minval=-bound, maxval=bound,
            dtype=jnp.float32)
        params[f"b{i + 1}"] = jax.random.uniform(
            keys[2 * i + 1], (1, fan_out), minval=-bound, maxval=bound,
            dtype=jnp.float32)
    return params


def critic_reference(state, action, params):
    """Plain-JAX f32 reference of the PyTorch forward for a correctness check."""
    x = jnp.concatenate([state, action], axis=-1)
    h1 = jax.nn.relu(x @ params["w1"] + params["b1"])
    h1 = jax.nn.relu(h1 @ params["w2"] + params["b2"])
    q1 = h1 @ params["w3"] + params["b3"]
    h2 = jax.nn.relu(x @ params["w4"] + params["b4"])
    h2 = jax.nn.relu(h2 @ params["w5"] + params["b5"])
    q2 = h2 @ params["w6"] + params["b6"]
    return q1, q2


if __name__ == "__main__":
    # Batch large enough to exercise the batch grid (2 tiles of 128),
    # still tiny in absolute terms.
    B, state_dim, action_dim = 256, 16, 8

    key = jax.random.PRNGKey(0)
    k_state, k_action, k_params = jax.random.split(key, 3)

    state = jax.random.normal(k_state, (B, state_dim), dtype=jnp.float32)
    action = jax.random.normal(k_action, (B, action_dim), dtype=jnp.float32)
    params = init_critic_params(k_params, state_dim, action_dim)
    packed = pack_critic_params(params, state_dim)   # one-time pack/cast

    q1, q2 = critic_forward(state, action, packed, block_b=128)
    jax.block_until_ready((q1, q2))

    q1_ref, q2_ref = critic_reference(state, action, params)
    assert q1.shape == (B, 1) and q2.shape == (B, 1)
    # bf16 weight/matmul-input storage => slightly looser tolerance vs f32 ref.
    assert jnp.allclose(q1, q1_ref, atol=5e-2, rtol=5e-2)
    assert jnp.allclose(q2, q2_ref, atol=5e-2, rtol=5e-2)

    print("KERNEL_OK")
</pallas_src>

<mosaic_0001>
module attributes {stable_mosaic.version = 11 : i64} {
  func.func @critic_kernel(%arg0: i32, %arg1: memref<128x16xf32, #tpu.memory_space<vmem>>, %arg2: memref<128x8xf32, #tpu.memory_space<vmem>>, %arg3: memref<16x512xbf16, #tpu.memory_space<vmem>>, %arg4: memref<8x512xbf16, #tpu.memory_space<vmem>>, %arg5: memref<512x256xbf16, #tpu.memory_space<vmem>>, %arg6: memref<4x512xf32, #tpu.memory_space<vmem>>, %arg7: memref<128x1xf32, #tpu.memory_space<vmem>>, %arg8: memref<128x1xf32, #tpu.memory_space<vmem>>) attributes {dimension_semantics = [#tpu.dimension_semantics<parallel>], iteration_bounds = array<i64: 2>, scalar_prefetch = 0 : i64, scratch_operands = 0 : i64, tpu.core_type = #tpu.core_type<tc>, window_params = [{transform_indices = @transform_0, window_bounds = array<i64: 128, 16>}, {transform_indices = @transform_1, window_bounds = array<i64: 128, 8>}, {pipeline_mode = #tpu.pipeline_mode<synchronous>, transform_indices = @transform_2, window_bounds = array<i64: 16, 512>}, {pipeline_mode = #tpu.pipeline_mode<synchronous>, transform_indices = @transform_3, window_bounds = array<i64: 8, 512>}, {pipeline_mode = #tpu.pipeline_mode<synchronous>, transform_indices = @transform_4, window_bounds = array<i64: 512, 256>}, {pipeline_mode = #tpu.pipeline_mode<synchronous>, transform_indices = @transform_5, window_bounds = array<i64: 4, 512>}, {transform_indices = @transform_6, window_bounds = array<i64: 128, 1>}, {transform_indices = @transform_7, window_bounds = array<i64: 128, 1>}]} {
    %c0 = arith.constant 0 : index
    %c0_0 = arith.constant 0 : index
    %0 = vector.load %arg1[%c0, %c0_0] : memref<128x16xf32, #tpu.memory_space<vmem>>, vector<128x16xf32>
    %1 = arith.truncf %0 : vector<128x16xf32> to vector<128x16xbf16>
    %c0_1 = arith.constant 0 : index
    %c0_2 = arith.constant 0 : index
    %2 = vector.load %arg2[%c0_1, %c0_2] : memref<128x8xf32, #tpu.memory_space<vmem>>, vector<128x8xf32>
    %3 = arith.truncf %2 : vector<128x8xf32> to vector<128x8xbf16>
    %c0_3 = arith.constant 0 : index
    %c0_4 = arith.constant 0 : index
    %4 = vector.load %arg6[%c0_3, %c0_4] : memref<4x512xf32, #tpu.memory_space<vmem>>, vector<4x512xf32>
    %c0_5 = arith.constant 0 : index
    %c0_6 = arith.constant 0 : index
    %5 = vector.load %arg3[%c0_5, %c0_6] : memref<16x512xbf16, #tpu.memory_space<vmem>>, vector<16x512xbf16>
    %cst = arith.constant dense<0.000000e+00> : vector<128x512xf32>
    %6 = tpu.matmul %1, %5, %cst {dimension_numbers = #tpu.dot_dimension_numbers<[1], [0], [0], [1], [0, 0, 1, 1], [], []>} : vector<128x16xbf16>, vector<16x512xbf16>, vector<128x512xf32> -> vector<128x512xf32>
    %c0_7 = arith.constant 0 : index
    %c0_8 = arith.constant 0 : index
    %7 = vector.load %arg4[%c0_7, %c0_8] : memref<8x512xbf16, #tpu.memory_space<vmem>>, vector<8x512xbf16>
    %cst_9 = arith.constant dense<0.000000e+00> : vector<128x512xf32>
    %8 = tpu.matmul %3, %7, %cst_9 {dimension_numbers = #tpu.dot_dimension_numbers<[1], [0], [0], [1], [0, 0, 1, 1], [], []>} : vector<128x8xbf16>, vector<8x512xbf16>, vector<128x512xf32> -> vector<128x512xf32>
    %9 = arith.addf %6, %8 : vector<128x512xf32>
    %10 = vector.extract_strided_slice %4 {offsets = [0, 0], sizes = [1, 512], strides = [1, 1]} : vector<4x512xf32> to vector<1x512xf32>
    %11 = vector.broadcast %10 : vector<1x512xf32> to vector<128x512xf32>
    %12 = arith.addf %9, %11 : vector<128x512xf32>
    %cst_10 = arith.constant 0.000000e+00 : f32
    %13 = vector.broadcast %cst_10 : f32 to vector<128x512xf32>
    %14 = arith.maximumf %12, %13 : vector<128x512xf32>
    %15 = vector.extract_strided_slice %14 {offsets = [0, 0], sizes = [128, 256], strides = [1, 1]} : vector<128x512xf32> to vector<128x256xf32>
    %16 = arith.truncf %15 : vector<128x256xf32> to vector<128x256xbf16>
    %17 = vector.extract_strided_slice %14 {offsets = [0, 256], sizes = [128, 256], strides = [1, 1]} : vector<128x512xf32> to vector<128x256xf32>
    %18 = arith.truncf %17 : vector<128x256xf32> to vector<128x256xbf16>
    %c0_11 = arith.constant 0 : index
    %c0_12 = arith.constant 0 : index
    %19 = vector.load %arg5[%c0_11, %c0_12] : memref<512x256xbf16, #tpu.memory_space<vmem>>, vector<256x256xbf16>
    %cst_13 = arith.constant dense<0.000000e+00> : vector<128x256xf32>
    %20 = tpu.matmul %16, %19, %cst_13 {dimension_numbers = #tpu.dot_dimension_numbers<[1], [0], [0], [1], [0, 0, 1, 1], [], []>} : vector<128x256xbf16>, vector<256x256xbf16>, vector<128x256xf32> -> vector<128x256xf32>
    %c256 = arith.constant 256 : index
    %c0_14 = arith.constant 0 : index
    %21 = vector.load %arg5[%c256, %c0_14] : memref<512x256xbf16, #tpu.memory_space<vmem>>, vector<256x256xbf16>
    %cst_15 = arith.constant dense<0.000000e+00> : vector<128x256xf32>
    %22 = tpu.matmul %18, %21, %cst_15 {dimension_numbers = #tpu.dot_dimension_numbers<[1], [0], [0], [1], [0, 0, 1, 1], [], []>} : vector<128x256xbf16>, vector<256x256xbf16>, vector<128x256xf32> -> vector<128x256xf32>
    %23 = vector.extract_strided_slice %4 {offsets = [1, 0], sizes = [1, 256], strides = [1, 1]} : vector<4x512xf32> to vector<1x256xf32>
    %24 = vector.broadcast %23 : vector<1x256xf32> to vector<128x256xf32>
    %25 = arith.addf %20, %24 : vector<128x256xf32>
    %cst_16 = arith.constant 0.000000e+00 : f32
    %26 = vector.broadcast %cst_16 : f32 to vector<128x256xf32>
    %27 = arith.maximumf %25, %26 : vector<128x256xf32>
    %28 = vector.extract_strided_slice %4 {offsets = [1, 256], sizes = [1, 256], strides = [1, 1]} : vector<4x512xf32> to vector<1x256xf32>
    %29 = vector.broadcast %28 : vector<1x256xf32> to vector<128x256xf32>
    %30 = arith.addf %22, %29 : vector<128x256xf32>
    %cst_17 = arith.constant 0.000000e+00 : f32
    %31 = vector.broadcast %cst_17 : f32 to vector<128x256xf32>
    %32 = arith.maximumf %30, %31 : vector<128x256xf32>
    %33 = vector.extract_strided_slice %4 {offsets = [2, 0], sizes = [1, 256], strides = [1, 1]} : vector<4x512xf32> to vector<1x256xf32>
    %34 = vector.broadcast %33 : vector<1x256xf32> to vector<128x256xf32>
    %35 = arith.mulf %27, %34 : vector<128x256xf32>
    %cst_18 = arith.constant dense<0.000000e+00> : vector<128xf32>
    %36 = vector.multi_reduction <add>, %35, %cst_18 [1] : vector<128x256xf32> to vector<128xf32>
    %37 = vector.shape_cast %36 : vector<128xf32> to vector<128x1xf32>
    %38 = vector.extract_strided_slice %4 {offsets = [3, 0], sizes = [1, 1], strides = [1, 1]} : vector<4x512xf32> to vector<1x1xf32>
    %39 = vector.broadcast %38 : vector<1x1xf32> to vector<128x1xf32>
    %40 = arith.addf %37, %39 : vector<128x1xf32>
    %c0_19 = arith.constant 0 : index
    %c0_20 = arith.constant 0 : index
    %41 = vector.load %arg7[%c0_19, %c0_20] : memref<128x1xf32, #tpu.memory_space<vmem>>, vector<128x1xf32>
    tpu.vector_store %arg7[%c0_19, %c0_20], %40 {strides = array<i32>} : memref<128x1xf32, #tpu.memory_space<vmem>>, vector<128x1xf32>,
    %42 = vector.extract_strided_slice %4 {offsets = [2, 256], sizes = [1, 256], strides = [1, 1]} : vector<4x512xf32> to vector<1x256xf32>
    %43 = vector.broadcast %42 : vector<1x256xf32> to vector<128x256xf32>
    %44 = arith.mulf %32, %43 : vector<128x256xf32>
    %cst_21 = arith.constant dense<0.000000e+00> : vector<128xf32>
    %45 = vector.multi_reduction <add>, %44, %cst_21 [1] : vector<128x256xf32> to vector<128xf32>
    %46 = vector.shape_cast %45 : vector<128xf32> to vector<128x1xf32>
    %47 = vector.extract_strided_slice %4 {offsets = [3, 1], sizes = [1, 1], strides = [1, 1]} : vector<4x512xf32> to vector<1x1xf32>
    %48 = vector.broadcast %47 : vector<1x1xf32> to vector<128x1xf32>
    %49 = arith.addf %46, %48 : vector<128x1xf32>
    %c0_22 = arith.constant 0 : index
    %c0_23 = arith.constant 0 : index
    %50 = vector.load %arg8[%c0_22, %c0_23] : memref<128x1xf32, #tpu.memory_space<vmem>>, vector<128x1xf32>
    tpu.vector_store %arg8[%c0_22, %c0_23], %49 {strides = array<i32>} : memref<128x1xf32, #tpu.memory_space<vmem>>, vector<128x1xf32>,
    return
  }
  func.func @transform_0(%arg0: i32) -> (i32, i32) {
    %c0_i32 = arith.constant 0 : i32
    %c0_i32_0 = arith.constant 0 : i32
    return %arg0, %c0_i32 : i32, i32
  }
  func.func @transform_1(%arg0: i32) -> (i32, i32) {
    %c0_i32 = arith.constant 0 : i32
    %c0_i32_0 = arith.constant 0 : i32
    return %arg0, %c0_i32 : i32, i32
  }
  func.func @transform_2(%arg0: i32) -> (i32, i32) {
    %c0_i32 = arith.constant 0 : i32
    %c0_i32_0 = arith.constant 0 : i32
    %c0_i32_1 = arith.constant 0 : i32
    return %c0_i32, %c0_i32_0 : i32, i32
  }
  func.func @transform_3(%arg0: i32) -> (i32, i32) {
    %c0_i32 = arith.constant 0 : i32
    %c0_i32_0 = arith.constant 0 : i32
    %c0_i32_1 = arith.constant 0 : i32
    return %c0_i32, %c0_i32_0 : i32, i32
  }
  func.func @transform_4(%arg0: i32) -> (i32, i32) {
    %c0_i32 = arith.constant 0 : i32
    %c0_i32_0 = arith.constant 0 : i32
    %c0_i32_1 = arith.constant 0 : i32
    return %c0_i32, %c0_i32_0 : i32, i32
  }
  func.func @transform_5(%arg0: i32) -> (i32, i32) {
    %c0_i32 = arith.constant 0 : i32
    %c0_i32_0 = arith.constant 0 : i32
    %c0_i32_1 = arith.constant 0 : i32
    return %c0_i32, %c0_i32_0 : i32, i32
  }
  func.func @transform_6(%arg0: i32) -> (i32, i32) {
    %c0_i32 = arith.constant 0 : i32
    %c0_i32_0 = arith.constant 0 : i32
    return %arg0, %c0_i32 : i32, i32
  }
  func.func @transform_7(%arg0: i32) -> (i32, i32) {
    %c0_i32 = arith.constant 0 : i32
    %c0_i32_0 = arith.constant 0 : i32
    return %arg0, %c0_i32 : i32, i32
  }
}

</mosaic_0001>

<bundles_post_ra>
// kernel: tpu_custom_call.1
= control target key start
LH: loop header
LB: loop body
LE: loop exit
PB: predicated region body
PF: predicated region fallthrough
CT: control target
= control target key end

     0   :  { %13 = vsyncpa [#allocation3], 0  ;;  %s2682_s24 = smov 0   ;;  %s3440_s0 = inlined_call_operand.vmem [shape: f32[256,16], index: 0, kind: input, shape index: {}]   ;;  %s3441_s1 = inlined_call_operand.vmem [shape: f32[256,8], index: 1, kind: input, shape index: {}]   ;;  %s3442_s2 = inlined_call_operand.vmem [shape: bf16[16,512], index: 2, kind: input, shape index: {}]   ;;  %s3443_s3 = inlined_call_operand.vmem [shape: bf16[8,512], index: 3, kind: input, shape index: {}]   ;;  %s3444_s4 = inlined_call_operand.vmem [shape: bf16[512,256], index: 4, kind: input, shape index: {}]   ;;  %s3445_s5 = inlined_call_operand.hbm [shape: f32[4,512], index: 5, kind: input, shape index: {}]   ;;  %s3446_s6 = inlined_call_operand.vmem [shape: f32[256,1], index: 6, kind: output, shape index: {0}]   ;;  %s3447_s7 = inlined_call_operand.vmem [shape: f32[256,1], index: 7, kind: output, shape index: {1}]  }
   0x1 LB: > { %s2284_s25 = sadd.s32 4294967295, %s2637_s24   ;;  %p2286_p0 = scmp.ge.s32.totalorder %s2637_s24, 1  ;;  %s2637_s24 = sphi %s2682_s24, %s19_s24  }
   0x2   : > { %p212_p1 = scmp.lt.s32.totalorder %s2637_s24, 3  ;;  %p2696_p3 = scmp.eq.s32.totalorder %s2284_s25, 0 }
   0x3   : > { %s2639_s28 = smov [#allocation2]   ;;  %s2599_s10 = scalar_lea.hbm %s3445_s5, 256 }
   0x4   : > { %p2690_p2 = pnand %p2286_p0, %p212_p1  ;;  %s234_s29 = sshll.u32 %s2639_s28, 4  ;;  %s235_s29 = int_to_ptr.vmem [resolvable:$true] %s234_s29 }
   0x5   : > { %s3452_s27 = scalar_select %p2696_p3, 1, 0 }
   0x6   : > { %s3451_s26 = scalar_select %p2690_p2, 1, 0 }
   0x7   : > { %p2475_p4 = pneg %p2690_p2  ;;  %p2600_p6 = scmp.ne.s32.totalorder %s3445_s5, %s2599_s10 }
   0x8   : > { %p2606_p10 = scmp.lt.u32.totalorder %s2599_s10, %s3445_s5 }
   0x9   : > { %p2704_p5 = pnand %p2696_p3, %p2475_p4 }
   0xb   : > { %p2601_p7 = pneg %p2704_p5 }
   0xd   : > { %p2602_p8 = pnand %p2601_p7, %p2600_p6 }
   0xf   : > { %p2603_p9 = pneg %p2602_p8 }
  0x11   : > { %p2608_p11 = pnand %p2606_p10, %p2603_p9 }
  0x13   : > { %2611 = shalt.err (!%p2608_p11)
}
  0x14   : > { %s2612_s15 = scalar_lea.vmem %s235_s29, 256  ;;  %p2620_p1 = scmp.lt.s32.totalorder %s235_s29, %s235_s29 }
  0x15   : > { %p2613_p12 = scmp.ne.s32.totalorder %s235_s29, %s2612_s15  ;;  %p2621_p4 = scmp.lt.s32.totalorder %s2612_s15, %s2612_s15 }
  0x17   : > { %p2615_p13 = pnand %p2613_p12, %p2601_p7  ;;  %p2622_p3 = por %p2621_p4, %p2620_p1 }
  0x19   : > { %p2616_p0 = pneg %p2615_p13 }
  0x1b   : > { %p2623_p2 = pnand %p2622_p3, %p2616_p0 }
  0x1d   : > { %2626 = shalt.err (!%p2623_p2)
}
  0x1e   : > { %2478 = dma.hbm_to_vmem [thread:$0]  (!%p2704_p5), %s3445_s5, 256, %s235_s29, [#allocation3]  }
  0x1f   : > { %p3454_p6 = scmp.ne.s32.totalorder %s3451_s26, 0 }
  0x20   : > { %p3455_p8 = scmp.ne.s32.totalorder (!%p3454_p6), %s3452_s27, 0 }
  0x21   : > { %265 = sbr.rel (%p3454_p6) target bundleno = 883 (0x373), region = 44 }
  0x28   : > { %2632 = dma.done.wait (%p3455_p8), [#allocation3], 256  }
  0x29   : > { %2634 = vsyncadd (%p3455_p8), [#allocation3], 4294967040  ;;  %s2291_s18 = sshll.u32 %s2284_s25, 4  ;;  %v2640_v0 = vmov 0   ;;  %v386_v1 = vld [vmem:[%s3443_s3] sm:$0xff]  ;;  %vm423_vm0 = vcmask 1043456  }
  0x2a   : > { %468 = vmatprep.mubr.bf16.mxu0 %v2640_v0  ;;  %581 = vmatprep.mubr.bf16.mxu1 %v2640_v0  ;;  %p308_p2 = scmp.lt.s32.totalorder %s2291_s18, 31  ;;  %v387_v2 = vld [vmem:[%s3443_s3 + $0x8] sm:$0xff]  ;;  %v2300_v4 = vcombine.high %v386_v1, %v386_v1  ;;  %v2299_v6 = vcombine.low %v386_v1, %v386_v1  ;;  %vm398_vm1 = vcmask 64512   ;;  %v2501_v14 = vld [vmem:[%s3442_s2 + $0x4] ss:$16 sps:$4 sm:$0xff]   ;;  %vm682_vm2 = vcmask 130048  }
  0x2b   : > { %v2302_v5 = vcombine.high %v387_v2, %v387_v2  ;;  %v2301_v7 = vcombine.low %v387_v2, %v387_v2  ;;  %v2498_v9 = vld [vmem:[%s3442_s2 + $0xc] ss:$16 sps:$4 sm:$0xff]   ;;  %v2496_v13 = vld [vmem:[%s3442_s2 + $0x8] ss:$16 sps:$4 sm:$0xff]   ;;  %v2499_v15 = vld [vmem:[%s3442_s2] ss:$16 sps:$4 sm:$0xff]  }
  0x2c   : > { %s3457_s18 = smov (!%p308_p2, %s2291_s18), 31  ;;  %2303 = vmatprep.subr.msk.bf16.mxu0 %vm423_vm0, %v2300_v4  ;;  %v425_v10 = vsel %vm423_vm0, %v2299_v6, 0  ;;  %v2504_v20 = vld [vmem:[%s3444_s4 + $0x4] ss:$8 sps:$4 sm:$0xff]   ;;  %v2502_v42 = vld [vmem:[%s3444_s4] ss:$8 sps:$4 sm:$0xff]  }
  0x2d   : > { %s2734_s19 = sshll.u32 %s3457_s18, 3  ;;  %2312 = vmatprep.subr.msk.bf16.mxu1 %vm423_vm0, %v2302_v5  ;;  %v431_v11 = vsel %vm423_vm0, %v2301_v7, 0  ;;  %437 = vmatpush1.bf16.msra.mxu0 %v425_v10  ;;  %v2507_v22 = vld [vmem:[%s3444_s4 + $0x104] ss:$8 sps:$4 sm:$0xff]   ;;  %v2505_v43 = vld [vmem:[%s3444_s4 + $0x100] ss:$8 sps:$4 sm:$0xff]  }
  0x2e   : > { %s2740_s22 = scalar_lea.vmem %s3441_s1, %s2734_s19  ;;  %550 = vmatpush1.bf16.msra.mxu1 %v431_v11  ;;  %707 = vmatprep.subr.bf16.mxu0 %v2501_v14  ;;  %s2814_s20 = scalar_lea.vmem %s3440_s0, %s2734_s19  ;;  %v2510_v44 = vld [vmem:[%s3444_s4 + $0x14] ss:$8 sps:$4 sm:$0xff]   ;;  %v2508_v48 = vld [vmem:[%s3444_s4 + $0x10] ss:$8 sps:$4 sm:$0xff]   ;;  %v2516_v50 = vld [vmem:[%s3444_s4 + $0x24] ss:$8 sps:$4 sm:$0xff]  }
  0x2f   : > { %v356_v3 = vld [vmem:[%s2740_s22] sm:$0xff]  ;;  %v357_v8 = vld [vmem:[%s2740_s22 + $0x8] sm:$0xff]  ;;  %820 = vmatprep.subr.bf16.mxu1 %v2498_v9  ;;  %v358_v16 = vld [vmem:[%s2740_s22 + $0x10] sm:$0xff]  ;;  %s3318_s27 = scalar_lea.vmem %s3446_s6, %s2734_s19  ;;  %vm1959_vm3 = vcmask 7168   ;;  %s2641_s28 = smov 127  }
  0x30   : > { %v372_v12 = vpack.c.bf16 %v357_v8, %v356_v3  ;;  %v359_v17 = vld [vmem:[%s2740_s22 + $0x18] sm:$0xff]  ;;  %v360_v19 = vld [vmem:[%s2740_s22 + $0x20] sm:$0xff]  ;;  %v361_v21 = vld [vmem:[%s2740_s22 + $0x28] sm:$0xff]  ;;  %s3403_s30 = scalar_lea.vmem %s3447_s7, %s2734_s19 }
  0x31   : > { %v373_v18 = vpack.c.bf16 %v359_v17, %v358_v16  ;;  %v374_v23 = vpack.c.bf16 %v361_v21, %v360_v19  ;;  %v362_v24 = vld [vmem:[%s2740_s22 + $0x30] sm:$0xff]  ;;  %v363_v25 = vld [vmem:[%s2740_s22 + $0x38] sm:$0xff]  ;;  %v364_v27 = vld [vmem:[%s2740_s22 + $0x40] sm:$0xff] }
  0x32   : > { %2304 = vmatmul.mubr.msk.bf16.vlgmr.msra.gmra.mrb[0].mxu0 %vm398_vm1, %v372_v12  ;;  %2313 = vmatmul.mubr.msk.bf16.vlgmr.msra.gmra.mrb[0].mxu1 %vm398_vm1, %v372_v12  ;;  %v375_v26 = vpack.c.bf16 %v363_v25, %v362_v24  ;;  %v365_v28 = vld [vmem:[%s2740_s22 + $0x48] sm:$0xff]  ;;  %v366_v30 = vld [vmem:[%s2740_s22 + $0x50] sm:$0xff]  ;;  %v367_v31 = vld [vmem:[%s2740_s22 + $0x58] sm:$0xff] }
  0x33   : > { %821 = vmatpush1.bf16.msra.mxu1 %v2496_v13  ;;  %478 = vmatprep.mubr.bf16.mxu0 %v2640_v0  ;;  %v376_v29 = vpack.c.bf16 %v365_v28, %v364_v27  ;;  %v377_v32 = vpack.c.bf16 %v367_v31, %v366_v30  ;;  %v368_v33 = vld [vmem:[%s2740_s22 + $0x60] sm:$0xff]  ;;  %v369_v34 = vld [vmem:[%s2740_s22 + $0x68] sm:$0xff]  ;;  %v370_v36 = vld [vmem:[%s2740_s22 + $0x70] sm:$0xff] }
  0x34   : > { %591 = vmatprep.mubr.bf16.mxu1 %v2640_v0  ;;  %708 = vmatpush1.bf16.msra.mxu0 %v2499_v15  ;;  %v378_v35 = vpack.c.bf16 %v369_v34, %v368_v33  ;;  %v371_v37 = vld [vmem:[%s2740_s22 + $0x78] sm:$0xff]  ;;  %v332_v39 = vld [vmem:[%s2814_s20] sm:$0xff]  ;;  %v333_v40 = vld [vmem:[%s2814_s20 + $0x8] sm:$0xff] }
  0x35   : > { %1373 = vmatprep.subr.bf16.mxu0 %v2504_v20  ;;  %1696 = vmatprep.subr.bf16.mxu1 %v2507_v22  ;;  %v379_v38 = vpack.c.bf16 %v371_v37, %v370_v36  ;;  %v348_v41 = vpack.c.bf16 %v333_v40, %v332_v39  ;;  %v2513_v45 = vld [vmem:[%s3444_s4 + $0x114] ss:$8 sps:$4 sm:$0xff]   ;;  %v2511_v49 = vld [vmem:[%s3444_s4 + $0x110] ss:$8 sps:$4 sm:$0xff]   ;;  %v2519_v51 = vld [vmem:[%s3444_s4 + $0x124] ss:$8 sps:$4 sm:$0xff]  }
  0x36   : > { %v334_v46 = vld [vmem:[%s2814_s20 + $0x10] sm:$0xff]  ;;  %v335_v47 = vld [vmem:[%s2814_s20 + $0x18] sm:$0xff]  ;;  %v2514_v53 = vld [vmem:[%s3444_s4 + $0x20] ss:$8 sps:$4 sm:$0xff]  }
  0x37   : > { %v349_v52 = vpack.c.bf16 %v335_v47, %v334_v46  ;;  %v2517_v54 = vld [vmem:[%s3444_s4 + $0x120] ss:$8 sps:$4 sm:$0xff]   ;;  %v2522_v55 = vld [vmem:[%s3444_s4 + $0x34] ss:$8 sps:$4 sm:$0xff]   ;;  %v2520_v59 = vld [vmem:[%s3444_s4 + $0x30] ss:$8 sps:$4 sm:$0xff]  }
  0x38   : > { %v2525_v56 = vld [vmem:[%s3444_s4 + $0x134] ss:$8 sps:$4 sm:$0xff]   ;;  %v336_v57 = vld [vmem:[%s2814_s20 + $0x20] sm:$0xff]  ;;  %v337_v58 = vld [vmem:[%s2814_s20 + $0x28] sm:$0xff] }
  0x39   : > { %v2523_v60 = vld [vmem:[%s3444_s4 + $0x130] ss:$8 sps:$4 sm:$0xff]   ;;  %v2528_v61 = vld [vmem:[%s3444_s4 + $0x44] ss:$8 sps:$4 sm:$0xff]   ;;  %v350_v63 = vpack.c.bf16 %v337_v58, %v336_v57  ;;  %v2526_v1 = vld [vmem:[%s3444_s4 + $0x40] ss:$8 sps:$4 sm:$0xff]  }
  0x3a   : > { %2305 = vmatmul.mubr.msk.bf16.gmra.mrb[4].mxu0 %vm398_vm1, %v373_v18  ;;  %2314 = vmatmul.mubr.msk.bf16.gmra.mrb[4].mxu1 %vm398_vm1, %v373_v18  ;;  %v2531_v62 = vld [vmem:[%s3444_s4 + $0x144] ss:$8 sps:$4 sm:$0xff]   ;;  %v2529_v2 = vld [vmem:[%s3444_s4 + $0x140] ss:$8 sps:$4 sm:$0xff]   ;;  %v2534_v3 = vld [vmem:[%s3444_s4 + $0x54] ss:$8 sps:$4 sm:$0xff]  }
  0x3b   : > { %488 = vmatprep.mubr.bf16.mxu0 %v2640_v0  ;;  %601 = vmatprep.mubr.bf16.mxu1 %v2640_v0  ;;  %v2537_v4 = vld [vmem:[%s3444_s4 + $0x154] ss:$8 sps:$4 sm:$0xff]   ;;  %v2532_v7 = vld [vmem:[%s3444_s4 + $0x50] ss:$8 sps:$4 sm:$0xff]   ;;  %v2540_v9 = vld [vmem:[%s3444_s4 + $0x64] ss:$8 sps:$4 sm:$0xff]  }
  0x3c   : > { %v338_v5 = vld [vmem:[%s2814_s20 + $0x30] sm:$0xff]  ;;  %v339_v6 = vld [vmem:[%s2814_s20 + $0x38] sm:$0xff]  ;;  %v2543_v10 = vld [vmem:[%s3444_s4 + $0x164] ss:$8 sps:$4 sm:$0xff]  }
  0x3d   : > { %v2535_v8 = vld [vmem:[%s3444_s4 + $0x150] ss:$8 sps:$4 sm:$0xff]   ;;  %v351_v11 = vpack.c.bf16 %v339_v6, %v338_v5  ;;  %v2538_v12 = vld [vmem:[%s3444_s4 + $0x60] ss:$8 sps:$4 sm:$0xff]   ;;  %v2546_v14 = vld [vmem:[%s3444_s4 + $0x74] ss:$8 sps:$4 sm:$0xff]  }
  0x3e   : > { %v2541_v13 = vld [vmem:[%s3444_s4 + $0x160] ss:$8 sps:$4 sm:$0xff]   ;;  %v2549_v15 = vld [vmem:[%s3444_s4 + $0x174] ss:$8 sps:$4 sm:$0xff]   ;;  %v2544_v18 = vld [vmem:[%s3444_s4 + $0x70] ss:$8 sps:$4 sm:$0xff]  }
  0x3f   : > { %v340_v16 = vld [vmem:[%s2814_s20 + $0x40] sm:$0xff]  ;;  %v341_v17 = vld [vmem:[%s2814_s20 + $0x48] sm:$0xff]  ;;  %v2547_v19 = vld [vmem:[%s3444_s4 + $0x170] ss:$8 sps:$4 sm:$0xff]  }
  0x40   : > { %v2552_v20 = vld [vmem:[%s3444_s4 + $0x84] ss:$8 sps:$4 sm:$0xff]   ;;  %v352_v22 = vpack.c.bf16 %v341_v17, %v340_v16  ;;  %v2553_v24 = vld [vmem:[%s3444_s4 + $0x180] ss:$8 sps:$4 sm:$0xff]   ;;  %v2558_v25 = vld [vmem:[%s3444_s4 + $0x94] ss:$8 sps:$4 sm:$0xff]  }
  0x41   : > { %v2555_v21 = vld [vmem:[%s3444_s4 + $0x184] ss:$8 sps:$4 sm:$0xff]   ;;  %v342_v27 = vld [vmem:[%s2814_s20 + $0x50] sm:$0xff]  ;;  %v343_v28 = vld [vmem:[%s2814_s20 + $0x58] sm:$0xff] }
  0x42   : > { %2306 = vmatmul.mubr.msk.bf16.gmra.mrb[8].mxu0 %vm398_vm1, %v374_v23  ;;  %2315 = vmatmul.mubr.msk.bf16.gmra.mrb[8].mxu1 %vm398_vm1, %v374_v23  ;;  %v2550_v23 = vld [vmem:[%s3444_s4 + $0x80] ss:$8 sps:$4 sm:$0xff]   ;;  %v2559_v30 = vld [vmem:[%s3444_s4 + $0x190] ss:$8 sps:$4 sm:$0xff]   ;;  %v2564_v31 = vld [vmem:[%s3444_s4 + $0xa4] ss:$8 sps:$4 sm:$0xff]   ;;  %v353_v33 = vpack.c.bf16 %v343_v28, %v342_v27 }
  0x43   : > { %498 = vmatprep.mubr.bf16.mxu0 %v2640_v0  ;;  %611 = vmatprep.mubr.bf16.mxu1 %v2640_v0  ;;  %v2562_v34 = vld [vmem:[%s3444_s4 + $0xa0] ss:$8 sps:$4 sm:$0xff]   ;;  %v2570_v36 = vld [vmem:[%s3444_s4 + $0xb4] ss:$8 sps:$4 sm:$0xff]   ;;  %v2568_v40 = vld [vmem:[%s3444_s4 + $0xb0] ss:$8 sps:$4 sm:$0xff]  }
  0x44   : > { %v2573_v37 = vld [vmem:[%s3444_s4 + $0x1b4] ss:$8 sps:$4 sm:$0xff]   ;;  %v345_v39 = vld [vmem:[%s2814_s20 + $0x68] sm:$0xff] }
  0x45   : > { %v2577_v46 = vld [vmem:[%s3444_s4 + $0x1c0] ss:$8 sps:$4 sm:$0xff]   ;;  %v2582_v47 = vld [vmem:[%s3444_s4 + $0xd4] ss:$8 sps:$4 sm:$0xff]  }
  0x46   : > { %v2594_v57 = vld [vmem:[%s3444_s4 + $0xf4] ss:$8 sps:$4 sm:$0xff]  }
  0x47   : > { %v2597_v58 = vld [vmem:[%s3444_s4 + $0x1f4] ss:$8 sps:$4 sm:$0xff]  }
  0x4a   : > { %2307 = vmatmul.mubr.msk.bf16.gmra.mrb[12].mxu0 %vm398_vm1, %v375_v26  ;;  %2316 = vmatmul.mubr.msk.bf16.gmra.mrb[12].mxu1 %vm398_vm1, %v375_v26  ;;  %v2561_v26 = vld [vmem:[%s3444_s4 + $0x194] ss:$8 sps:$4 sm:$0xff]  }
  0x4b   : > { %508 = vmatprep.mubr.bf16.mxu0 %v2640_v0  ;;  %621 = vmatprep.mubr.bf16.mxu1 %v2640_v0 }
  0x52   : > { %2308 = vmatmul.mubr.msk.bf16.gmra.mrb[16].mxu0 %vm398_vm1, %v376_v29  ;;  %2317 = vmatmul.mubr.msk.bf16.gmra.mrb[16].mxu1 %vm398_vm1, %v376_v29  ;;  %v2556_v29 = vld [vmem:[%s3444_s4 + $0x90] ss:$8 sps:$4 sm:$0xff]  }
  0x53   : > { %518 = vmatprep.mubr.bf16.mxu0 %v2640_v0  ;;  %631 = vmatprep.mubr.bf16.mxu1 %v2640_v0 }
  0x5a   : > { %2309 = vmatmul.mubr.msk.bf16.gmra.mrb[20].mxu0 %vm398_vm1, %v377_v32  ;;  %2318 = vmatmul.mubr.msk.bf16.gmra.mrb[20].mxu1 %vm398_vm1, %v377_v32  ;;  %v2567_v32 = vld [vmem:[%s3444_s4 + $0x1a4] ss:$8 sps:$4 sm:$0xff]  }
  0x5b   : > { %528 = vmatprep.mubr.bf16.mxu0 %v2640_v0  ;;  %641 = vmatprep.mubr.bf16.mxu1 %v2640_v0 }
  0x62   : > { %2310 = vmatmul.mubr.msk.bf16.gmra.mrb[24].mxu0 %vm398_vm1, %v378_v35  ;;  %2319 = vmatmul.mubr.msk.bf16.gmra.mrb[24].mxu1 %vm398_vm1, %v378_v35  ;;  %v2565_v35 = vld [vmem:[%s3444_s4 + $0x1a0] ss:$8 sps:$4 sm:$0xff]  }
  0x63   : > { %538 = vmatprep.mubr.bf16.mxu0 %v2640_v0  ;;  %651 = vmatprep.mubr.bf16.mxu1 %v2640_v0 }
  0x6a   : > { %2311 = vmatmul.mubr.msk.bf16.gmra.mrb[28].mxu0 %vm398_vm1, %v379_v38  ;;  %2320 = vmatmul.mubr.msk.bf16.gmra.mrb[28].mxu1 %vm398_vm1, %v379_v38  ;;  %v344_v38 = vld [vmem:[%s2814_s20 + $0x60] sm:$0xff] }
  0x6b   : > { %739 = vmatprep.mubr.bf16.mxu0 %v2640_v0  ;;  %852 = vmatprep.mubr.bf16.mxu1 %v2640_v0 }
  0x72   : > { %2325 = vmatmul.mubr.msk.bf16.vlgmr.msra.gmra.mrb[0].mxu0 %vm682_vm2, %v348_v41  ;;  %2333 = vmatmul.mubr.msk.bf16.vlgmr.msra.gmra.mrb[0].mxu1 %vm682_vm2, %v348_v41  ;;  %v2571_v41 = vld [vmem:[%s3444_s4 + $0x1b0] ss:$8 sps:$4 sm:$0xff]  }
  0x73   : > { %749 = vmatprep.mubr.bf16.mxu0 %v2640_v0  ;;  %862 = vmatprep.mubr.bf16.mxu1 %v2640_v0 }
  0x74   : > { %1374 = vmatpush1.bf16.msra.mxu0 %v2502_v42  ;;  %1697 = vmatpush1.bf16.msra.mxu1 %v2505_v43  ;;  %v2576_v42 = vld [vmem:[%s3444_s4 + $0xc4] ss:$8 sps:$4 sm:$0xff]  }
  0x75   : > { %1375 = vmatprep.subr.bf16.mxu0 %v2510_v44  ;;  %1698 = vmatprep.subr.bf16.mxu1 %v2513_v45  ;;  %v2579_v43 = vld [vmem:[%s3444_s4 + $0x1c4] ss:$8 sps:$4 sm:$0xff]   ;;  %v354_v44 = vpack.c.bf16 %v345_v39, %v344_v38  ;;  %v2574_v45 = vld [vmem:[%s3444_s4 + $0xc0] ss:$8 sps:$4 sm:$0xff]  }
  0x78   : > { %1376 = vmatpush1.bf16.msra.mxu0 %v2508_v48  ;;  %1699 = vmatpush1.bf16.msra.mxu1 %v2511_v49  ;;  %v2585_v48 = vld [vmem:[%s3444_s4 + $0x1d4] ss:$8 sps:$4 sm:$0xff]  }
  0x79   : > { %1377 = vmatprep.subr.bf16.mxu0 %v2516_v50  ;;  %1700 = vmatprep.subr.bf16.mxu1 %v2519_v51  ;;  %v346_v49 = vld [vmem:[%s2814_s20 + $0x70] sm:$0xff]  ;;  %v347_v50 = vld [vmem:[%s2814_s20 + $0x78] sm:$0xff] }
  0x7a   : > { %2326 = vmatmul.mubr.msk.bf16.gmra.mrb[4].mxu0 %vm682_vm2, %v349_v52  ;;  %2334 = vmatmul.mubr.msk.bf16.gmra.mrb[4].mxu1 %vm682_vm2, %v349_v52  ;;  %v2580_v51 = vld [vmem:[%s3444_s4 + $0xd0] ss:$8 sps:$4 sm:$0xff]  }
  0x7b   : > { %759 = vmatprep.mubr.bf16.mxu0 %v2640_v0  ;;  %872 = vmatprep.mubr.bf16.mxu1 %v2640_v0  ;;  %v2583_v52 = vld [vmem:[%s3444_s4 + $0x1d0] ss:$8 sps:$4 sm:$0xff]  }
  0x7c   : > { %1378 = vmatpush1.bf16.msra.mxu0 %v2514_v53  ;;  %1701 = vmatpush1.bf16.msra.mxu1 %v2517_v54  ;;  %v355_v53 = vpack.c.bf16 %v347_v50, %v346_v49  ;;  %v2591_v54 = vld [vmem:[%s3444_s4 + $0x1e4] ss:$8 sps:$4 sm:$0xff]  }
  0x7d   : > { %1379 = vmatprep.subr.bf16.mxu0 %v2522_v55  ;;  %1702 = vmatprep.subr.bf16.mxu1 %v2525_v56  ;;  %v2586_v55 = vld [vmem:[%s3444_s4 + $0xe0] ss:$8 sps:$4 sm:$0xff]  }
  0x7e   : > { %v2589_v56 = vld [vmem:[%s3444_s4 + $0x1e0] ss:$8 sps:$4 sm:$0xff]  }
  0x80   : > { %1380 = vmatpush1.bf16.msra.mxu0 %v2520_v59  ;;  %1703 = vmatpush1.bf16.msra.mxu1 %v2523_v60  ;;  %v2592_v59 = vld [vmem:[%s3444_s4 + $0xf0] ss:$8 sps:$4 sm:$0xff]  }
  0x81   : > { %1381 = vmatprep.subr.bf16.mxu0 %v2528_v61  ;;  %1704 = vmatprep.subr.bf16.mxu1 %v2531_v62  ;;  %v2595_v60 = vld [vmem:[%s3444_s4 + $0x1f0] ss:$8 sps:$4 sm:$0xff]   ;;  %v935_v61 = vlaneseq }
  0x82   : > { %2327 = vmatmul.mubr.msk.bf16.gmra.mrb[8].mxu0 %vm682_vm2, %v350_v63  ;;  %2335 = vmatmul.mubr.msk.bf16.gmra.mrb[8].mxu1 %vm682_vm2, %v350_v63 }
  0x83   : > { %769 = vmatprep.mubr.bf16.mxu0 %v2640_v0  ;;  %882 = vmatprep.mubr.bf16.mxu1 %v2640_v0  ;;  %v3052_v62 = vshrl.u32 %v935_v61, 7 }
  0x84   : > { %1382 = vmatpush1.bf16.msra.mxu0 %v2526_v1  ;;  %1705 = vmatpush1.bf16.msra.mxu1 %v2529_v2  ;;  %v3055_v1 = vld [vmem:[#allocation2] sm:$0xff]  ;;  %v3057_v2 = vld [vmem:[#allocation2 + $0x8] sm:$0xff] }
  0x85   : > { %1383 = vmatprep.subr.bf16.mxu0 %v2534_v3  ;;  %1706 = vmatprep.subr.bf16.mxu1 %v2537_v4  ;;  %v937_v63 = vsub.s32 0, %v3052_v62  ;;  %v941_v3 = vsub.s32 4, %v3052_v62 }
  0x87   : > { %v938_v4 = vrot.slane %v3055_v1, %v937_v63  ;;  %v946_v5 = vrot.slane %v3057_v2, %v937_v63  ;;  %v942_v6 = vrot.slane %v3055_v1, %v941_v3 }
  0x88   : > { %1384 = vmatpush1.bf16.msra.mxu0 %v2532_v7  ;;  %1707 = vmatpush1.bf16.msra.mxu1 %v2535_v8  ;;  %v950_v7 = vrot.slane %v3057_v2, %v941_v3 }
  0x89   : > { %1385 = vmatprep.subr.bf16.mxu0 %v2540_v9  ;;  %1708 = vmatprep.subr.bf16.mxu1 %v2543_v10  ;;  %v3064_v8 = vrot.slane %v938_v4, %v937_v63  ;;  %v3066_v9 = vrot.slane %v946_v5, %v937_v63  ;;  %v3068_v10 = vrot.slane %v942_v6, %v937_v63 }
  0x8a   : > { %2328 = vmatmul.mubr.msk.bf16.gmra.mrb[12].mxu0 %vm682_vm2, %v351_v11  ;;  %2336 = vmatmul.mubr.msk.bf16.gmra.mrb[12].mxu1 %vm682_vm2, %v351_v11  ;;  %v3070_v11 = vrot.slane %v950_v7, %v937_v63 }
  0x8b   : > { %779 = vmatprep.mubr.bf16.mxu0 %v2640_v0  ;;  %892 = vmatprep.mubr.bf16.mxu1 %v2640_v0 }
  0x8c   : > { %1386 = vmatpush1.bf16.msra.mxu0 %v2538_v12  ;;  %1709 = vmatpush1.bf16.msra.mxu1 %v2541_v13 }
  0x8d   : > { %1387 = vmatprep.subr.bf16.mxu0 %v2546_v14  ;;  %1710 = vmatprep.subr.bf16.mxu1 %v2549_v15 }
  0x90   : > { %1388 = vmatpush1.bf16.msra.mxu0 %v2544_v18  ;;  %1711 = vmatpush1.bf16.msra.mxu1 %v2547_v19 }
  0x91   : > { %1389 = vmatprep.subr.bf16.mxu0 %v2552_v20  ;;  %1712 = vmatprep.subr.bf16.mxu1 %v2555_v21 }
  0x92   : > { %2329 = vmatmul.mubr.msk.bf16.gmra.mrb[16].mxu0 %vm682_vm2, %v352_v22  ;;  %2337 = vmatmul.mubr.msk.bf16.gmra.mrb[16].mxu1 %vm682_vm2, %v352_v22 }
  0x93   : > { %789 = vmatprep.mubr.bf16.mxu0 %v2640_v0  ;;  %902 = vmatprep.mubr.bf16.mxu1 %v2640_v0 }
  0x94   : > { %1390 = vmatpush1.bf16.msra.mxu0 %v2550_v23  ;;  %1713 = vmatpush1.bf16.msra.mxu1 %v2553_v24 }
  0x95   : > { %1391 = vmatprep.subr.bf16.mxu0 %v2558_v25  ;;  %1714 = vmatprep.subr.bf16.mxu1 %v2561_v26 }
  0x98   : > { %1392 = vmatpush1.bf16.msra.mxu0 %v2556_v29  ;;  %1715 = vmatpush1.bf16.msra.mxu1 %v2559_v30 }
  0x99   : > { %1393 = vmatprep.subr.bf16.mxu0 %v2564_v31  ;;  %1716 = vmatprep.subr.bf16.mxu1 %v2567_v32 }
  0x9a   : > { %2330 = vmatmul.mubr.msk.bf16.gmra.mrb[20].mxu0 %vm682_vm2, %v353_v33  ;;  %2338 = vmatmul.mubr.msk.bf16.gmra.mrb[20].mxu1 %vm682_vm2, %v353_v33 }
  0x9b   : > { %799 = vmatprep.mubr.bf16.mxu0 %v2640_v0  ;;  %912 = vmatprep.mubr.bf16.mxu1 %v2640_v0 }
  0x9c   : > { %1394 = vmatpush1.bf16.msra.mxu0 %v2562_v34  ;;  %1717 = vmatpush1.bf16.msra.mxu1 %v2565_v35 }
  0x9d   : > { %1395 = vmatprep.subr.bf16.mxu0 %v2570_v36  ;;  %1718 = vmatprep.subr.bf16.mxu1 %v2573_v37 }
  0xa0   : > { %1396 = vmatpush1.bf16.msra.mxu0 %v2568_v40  ;;  %1719 = vmatpush1.bf16.msra.mxu1 %v2571_v41 }
  0xa1   : > { %1397 = vmatprep.subr.bf16.mxu0 %v2576_v42  ;;  %1720 = vmatprep.subr.bf16.mxu1 %v2579_v43 }
  0xa2   : > { %2331 = vmatmul.mubr.msk.bf16.gmra.mrb[24].mxu0 %vm682_vm2, %v354_v44  ;;  %2339 = vmatmul.mubr.msk.bf16.gmra.mrb[24].mxu1 %vm682_vm2, %v354_v44 }
  0xa3   : > { %809 = vmatprep.mubr.bf16.mxu0 %v2640_v0  ;;  %922 = vmatprep.mubr.bf16.mxu1 %v2640_v0  ;;  %v2588_v0 = vld [vmem:[%s3444_s4 + $0xe4] ss:$8 sps:$4 sm:$0xff]  }
  0xa4   : > { %1398 = vmatpush1.bf16.msra.mxu0 %v2574_v45  ;;  %1721 = vmatpush1.bf16.msra.mxu1 %v2577_v46 }
  0xa5   : > { %1399 = vmatprep.subr.bf16.mxu0 %v2582_v47  ;;  %1722 = vmatprep.subr.bf16.mxu1 %v2585_v48 }
  0xa8   : > { %1400 = vmatpush1.bf16.msra.mxu0 %v2580_v51  ;;  %1723 = vmatpush1.bf16.msra.mxu1 %v2583_v52 }
  0xa9   : > { %1401 = vmatprep.subr.bf16.mxu0 %v2588_v0  ;;  %1724 = vmatprep.subr.bf16.mxu1 %v2591_v54 }
  0xaa   : > { %2332 = vmatmul.mubr.msk.bf16.gmra.mrb[28].mxu0 %vm682_vm2, %v355_v53  ;;  %2340 = vmatmul.mubr.msk.bf16.gmra.mrb[28].mxu1 %vm682_vm2, %v355_v53 }
  0xac   : > { %1402 = vmatpush1.bf16.msra.mxu0 %v2586_v55  ;;  %1725 = vmatpush1.bf16.msra.mxu1 %v2589_v56 }
  0xad   : > { %1403 = vmatprep.subr.bf16.mxu0 %v2594_v57  ;;  %1726 = vmatprep.subr.bf16.mxu1 %v2597_v58 }
  0xb0   : > { %1404 = vmatpush1.bf16.msra.mxu0 %v2592_v59  ;;  %1727 = vmatpush1.bf16.msra.mxu1 %v2595_v60 }
 0x145   : > { %v741_v12 = vpop.f32.mrb[0].mxu0  ;;  %v854_v13 = vpop.f32.mrb[0].mxu1 }
 0x146   : > { %v971_v14 = vadd.f32 %v3064_v8, %v741_v12  ;;  %v973_v15 = vadd.f32 %v3066_v9, %v854_v13  ;;  %v743_v16 = vpop.f32.mrb[1].mxu0  ;;  %v856_v17 = vpop.f32.mrb[1].mxu1 }
 0x147   : > { %v972_v18 = vadd.f32 %v3068_v10, %v743_v16  ;;  %v974_v19 = vadd.f32 %v3070_v11, %v856_v17  ;;  %v745_v20 = vpop.f32.mrb[2].mxu0  ;;  %v858_v21 = vpop.f32.mrb[2].mxu1 }
 0x148   : > { %v975_v22 = vadd.f32 %v3064_v8, %v745_v20  ;;  %v977_v23 = vadd.f32 %v3066_v9, %v858_v21  ;;  %v747_v24 = vpop.f32.mrb[3].mxu0  ;;  %v860_v25 = vpop.f32.mrb[3].mxu1  ;;  %v1035_v28 = vmax.f32 %v971_v14, 0.0  ;;  %v1037_v29 = vmax.f32 %v973_v15, 0.0 }
 0x149   : > { %v976_v26 = vadd.f32 %v3068_v10, %v747_v24  ;;  %v978_v27 = vadd.f32 %v3070_v11, %v860_v25  ;;  %v1036_v32 = vmax.f32 %v972_v18, 0.0  ;;  %v1038_v33 = vmax.f32 %v974_v19, 0.0 }
 0x14a   : > { %v1039_v30 = vmax.f32 %v975_v22, 0.0  ;;  %v1041_v31 = vmax.f32 %v977_v23, 0.0 }
 0x14b   : > { %v1040_v34 = vmax.f32 %v976_v26, 0.0  ;;  %v1042_v35 = vmax.f32 %v978_v27, 0.0 }
 0x14c   : > { %v1099_v36 = vpack.c.bf16 %v1039_v30, %v1035_v28  ;;  %v1115_v37 = vpack.c.bf16 %v1041_v31, %v1037_v29 }
 0x14d   : > { %v1100_v38 = vpack.c.bf16 %v1040_v34, %v1036_v32  ;;  %v1116_v39 = vpack.c.bf16 %v1042_v35, %v1038_v33  ;;  %v751_v40 = vpop.f32.mrb[4].mxu0  ;;  %v864_v41 = vpop.f32.mrb[4].mxu1 }
 0x14e   : > { %v979_v42 = vadd.f32 %v3064_v8, %v751_v40  ;;  %v981_v43 = vadd.f32 %v3066_v9, %v864_v41  ;;  %v753_v44 = vpop.f32.mrb[5].mxu0  ;;  %v866_v45 = vpop.f32.mrb[5].mxu1 }
 0x14f   : > { %v980_v46 = vadd.f32 %v3068_v10, %v753_v44  ;;  %v982_v47 = vadd.f32 %v3070_v11, %v866_v45  ;;  %v755_v48 = vpop.f32.mrb[6].mxu0  ;;  %v868_v49 = vpop.f32.mrb[6].mxu1  ;;  %1405 = vmatprep.mubr.bf16.mxu0 %v1100_v38  ;;  %1728 = vmatprep.mubr.bf16.mxu1 %v1116_v39 }
 0x150   : > { %v983_v50 = vadd.f32 %v3064_v8, %v755_v48  ;;  %v985_v51 = vadd.f32 %v3066_v9, %v868_v49  ;;  %v757_v52 = vpop.f32.mrb[7].mxu0  ;;  %v870_v53 = vpop.f32.mrb[7].mxu1  ;;  %1406 = vmatmul.mubr.bf16.vlgmr.msra.gmra.mrb[32].mxu0 %v1099_v36  ;;  %1729 = vmatmul.mubr.bf16.vlgmr.msra.gmra.mrb[32].mxu1 %v1115_v37  ;;  %v1043_v55 = vmax.f32 %v979_v42, 0.0  ;;  %v1045_v56 = vmax.f32 %v981_v43, 0.0 }
 0x151   : > { %v984_v0 = vadd.f32 %v3068_v10, %v757_v52  ;;  %v986_v54 = vadd.f32 %v3070_v11, %v870_v53  ;;  %v1044_v59 = vmax.f32 %v980_v46, 0.0  ;;  %v1046_v60 = vmax.f32 %v982_v47, 0.0 }
 0x152   : > { %v1047_v57 = vmax.f32 %v983_v50, 0.0  ;;  %v1049_v58 = vmax.f32 %v985_v51, 0.0 }
 0x153   : > { %v1048_v61 = vmax.f32 %v984_v0, 0.0  ;;  %v1050_v63 = vmax.f32 %v986_v54, 0.0 }
 0x154   : > { %v1101_v3 = vpack.c.bf16 %v1047_v57, %v1043_v55  ;;  %v1117_v4 = vpack.c.bf16 %v1049_v58, %v1045_v56 }
 0x155   : > { %v1102_v5 = vpack.c.bf16 %v1048_v61, %v1044_v59  ;;  %v1118_v6 = vpack.c.bf16 %v1050_v63, %v1046_v60  ;;  %v761_v7 = vpop.f32.mrb[8].mxu0  ;;  %v874_v12 = vpop.f32.mrb[8].mxu1 }
 0x156   : > { %v987_v13 = vadd.f32 %v3064_v8, %v761_v7  ;;  %v989_v14 = vadd.f32 %v3066_v9, %v874_v12  ;;  %v763_v15 = vpop.f32.mrb[9].mxu0  ;;  %v876_v16 = vpop.f32.mrb[9].mxu1 }
 0x157   : > { %v988_v17 = vadd.f32 %v3068_v10, %v763_v15  ;;  %v990_v18 = vadd.f32 %v3070_v11, %v876_v16  ;;  %v765_v19 = vpop.f32.mrb[10].mxu0  ;;  %v878_v20 = vpop.f32.mrb[10].mxu1  ;;  %1415 = vmatprep.mubr.bf16.mxu0 %v1102_v5  ;;  %1738 = vmatprep.mubr.bf16.mxu1 %v1118_v6 }
 0x158   : > { %v991_v21 = vadd.f32 %v3064_v8, %v765_v19  ;;  %v993_v22 = vadd.f32 %v3066_v9, %v878_v20  ;;  %v767_v23 = vpop.f32.mrb[11].mxu0  ;;  %v880_v24 = vpop.f32.mrb[11].mxu1  ;;  %1416 = vmatmul.mubr.bf16.gmra.mrb[36].mxu0 %v1101_v3  ;;  %1739 = vmatmul.mubr.bf16.gmra.mrb[36].mxu1 %v1117_v4  ;;  %v1051_v27 = vmax.f32 %v987_v13, 0.0  ;;  %v1053_v28 = vmax.f32 %v989_v14, 0.0 }
 0x159   : > { %v992_v25 = vadd.f32 %v3068_v10, %v767_v23  ;;  %v994_v26 = vadd.f32 %v3070_v11, %v880_v24  ;;  %v1052_v31 = vmax.f32 %v988_v17, 0.0  ;;  %v1054_v32 = vmax.f32 %v990_v18, 0.0 }
 0x15a   : > { %v1055_v29 = vmax.f32 %v991_v21, 0.0  ;;  %v1057_v30 = vmax.f32 %v993_v22, 0.0 }
 0x15b   : > { %v1056_v33 = vmax.f32 %v992_v25, 0.0  ;;  %v1058_v34 = vmax.f32 %v994_v26, 0.0 }
 0x15c   : > { %v1103_v35 = vpack.c.bf16 %v1055_v29, %v1051_v27  ;;  %v1119_v36 = vpack.c.bf16 %v1057_v30, %v1053_v28 }
 0x15d   : > { %v1104_v37 = vpack.c.bf16 %v1056_v33, %v1052_v31  ;;  %v1120_v38 = vpack.c.bf16 %v1058_v34, %v1054_v32  ;;  %v771_v39 = vpop.f32.mrb[12].mxu0  ;;  %v884_v40 = vpop.f32.mrb[12].mxu1 }
 0x15e   : > { %v995_v41 = vadd.f32 %v3064_v8, %v771_v39  ;;  %v997_v42 = vadd.f32 %v3066_v9, %v884_v40  ;;  %v773_v43 = vpop.f32.mrb[13].mxu0  ;;  %v886_v44 = vpop.f32.mrb[13].mxu1 }
 0x15f   : > { %v996_v45 = vadd.f32 %v3068_v10, %v773_v43  ;;  %v998_v46 = vadd.f32 %v3070_v11, %v886_v44  ;;  %v775_v47 = vpop.f32.mrb[14].mxu0  ;;  %v888_v48 = vpop.f32.mrb[14].mxu1  ;;  %1425 = vmatprep.mubr.bf16.mxu0 %v1104_v37  ;;  %1748 = vmatprep.mubr.bf16.mxu1 %v1120_v38 }
 0x160   : > { %v999_v49 = vadd.f32 %v3064_v8, %v775_v47  ;;  %v1001_v50 = vadd.f32 %v3066_v9, %v888_v48  ;;  %v777_v51 = vpop.f32.mrb[15].mxu0  ;;  %v890_v52 = vpop.f32.mrb[15].mxu1  ;;  %1426 = vmatmul.mubr.bf16.gmra.mrb[40].mxu0 %v1103_v35  ;;  %1749 = vmatmul.mubr.bf16.gmra.mrb[40].mxu1 %v1119_v36  ;;  %v1059_v54 = vmax.f32 %v995_v41, 0.0  ;;  %v1061_v55 = vmax.f32 %v997_v42, 0.0 }
 0x161   : > { %v1000_v53 = vadd.f32 %v3068_v10, %v777_v51  ;;  %v1002_v0 = vadd.f32 %v3070_v11, %v890_v52  ;;  %v1060_v58 = vmax.f32 %v996_v45, 0.0  ;;  %v1062_v59 = vmax.f32 %v998_v46, 0.0 }
 0x162   : > { %v1063_v56 = vmax.f32 %v999_v49, 0.0  ;;  %v1065_v57 = vmax.f32 %v1001_v50, 0.0 }
 0x163   : > { %v1064_v60 = vmax.f32 %v1000_v53, 0.0  ;;  %v1066_v61 = vmax.f32 %v1002_v0, 0.0 }
 0x164   : > { %v1105_v63 = vpack.c.bf16 %v1063_v56, %v1059_v54  ;;  %v1121_v3 = vpack.c.bf16 %v1065_v57, %v1061_v55 }
 0x165   : > { %v1106_v4 = vpack.c.bf16 %v1064_v60, %v1060_v58  ;;  %v1122_v5 = vpack.c.bf16 %v1066_v61, %v1062_v59  ;;  %v781_v6 = vpop.f32.mrb[16].mxu0  ;;  %v894_v7 = vpop.f32.mrb[16].mxu1 }
 0x166   : > { %v1003_v12 = vadd.f32 %v3064_v8, %v781_v6  ;;  %v1005_v13 = vadd.f32 %v3066_v9, %v894_v7  ;;  %v783_v14 = vpop.f32.mrb[17].mxu0  ;;  %v896_v15 = vpop.f32.mrb[17].mxu1 }
 0x167   : > { %v1004_v16 = vadd.f32 %v3068_v10, %v783_v14  ;;  %v1006_v17 = vadd.f32 %v3070_v11, %v896_v15  ;;  %v785_v18 = vpop.f32.mrb[18].mxu0  ;;  %v898_v19 = vpop.f32.mrb[18].mxu1  ;;  %1435 = vmatprep.mubr.bf16.mxu0 %v1106_v4  ;;  %1758 = vmatprep.mubr.bf16.mxu1 %v1122_v5 }
 0x168   : > { %v1007_v20 = vadd.f32 %v3064_v8, %v785_v18  ;;  %v1009_v21 = vadd.f32 %v3066_v9, %v898_v19  ;;  %v787_v22 = vpop.f32.mrb[19].mxu0  ;;  %v900_v23 = vpop.f32.mrb[19].mxu1  ;;  %1436 = vmatmul.mubr.bf16.gmra.mrb[44].mxu0 %v1105_v63  ;;  %1759 = vmatmul.mubr.bf16.gmra.mrb[44].mxu1 %v1121_v3  ;;  %v1067_v26 = vmax.f32 %v1003_v12, 0.0  ;;  %v1069_v27 = vmax.f32 %v1005_v13, 0.0 }
 0x169   : > { %v1008_v24 = vadd.f32 %v3068_v10, %v787_v22  ;;  %v1010_v25 = vadd.f32 %v3070_v11, %v900_v23  ;;  %v1068_v30 = vmax.f32 %v1004_v16, 0.0  ;;  %v1070_v31 = vmax.f32 %v1006_v17, 0.0 }
 0x16a   : > { %v1071_v28 = vmax.f32 %v1007_v20, 0.0  ;;  %v1073_v29 = vmax.f32 %v1009_v21, 0.0 }
 0x16b   : > { %v1072_v32 = vmax.f32 %v1008_v24, 0.0  ;;  %v1074_v33 = vmax.f32 %v1010_v25, 0.0 }
 0x16c   : > { %v1107_v34 = vpack.c.bf16 %v1071_v28, %v1067_v26  ;;  %v1123_v35 = vpack.c.bf16 %v1073_v29, %v1069_v27 }
 0x16d   : > { %v1108_v36 = vpack.c.bf16 %v1072_v32, %v1068_v30  ;;  %v1124_v37 = vpack.c.bf16 %v1074_v33, %v1070_v31  ;;  %v791_v38 = vpop.f32.mrb[20].mxu0  ;;  %v904_v39 = vpop.f32.mrb[20].mxu1 }
 0x16e   : > { %v1011_v40 = vadd.f32 %v3064_v8, %v791_v38  ;;  %v1013_v41 = vadd.f32 %v3066_v9, %v904_v39  ;;  %v793_v42 = vpop.f32.mrb[21].mxu0  ;;  %v906_v43 = vpop.f32.mrb[21].mxu1 }
 0x16f   : > { %v1012_v44 = vadd.f32 %v3068_v10, %v793_v42  ;;  %v1014_v45 = vadd.f32 %v3070_v11, %v906_v43  ;;  %v795_v46 = vpop.f32.mrb[22].mxu0  ;;  %v908_v47 = vpop.f32.mrb[22].mxu1  ;;  %1445 = vmatprep.mubr.bf16.mxu0 %v1108_v36  ;;  %1768 = vmatprep.mubr.bf16.mxu1 %v1124_v37 }
 0x170   : > { %v1015_v48 = vadd.f32 %v3064_v8, %v795_v46  ;;  %v1017_v49 = vadd.f32 %v3066_v9, %v908_v47  ;;  %v797_v50 = vpop.f32.mrb[23].mxu0  ;;  %v910_v51 = vpop.f32.mrb[23].mxu1  ;;  %1446 = vmatmul.mubr.bf16.gmra.mrb[48].mxu0 %v1107_v34  ;;  %1769 = vmatmul.mubr.bf16.gmra.mrb[48].mxu1 %v1123_v35  ;;  %v1075_v0 = vmax.f32 %v1011_v40, 0.0  ;;  %v1077_v54 = vmax.f32 %v1013_v41, 0.0 }
 0x171   : > { %v1016_v52 = vadd.f32 %v3068_v10, %v797_v50  ;;  %v1018_v53 = vadd.f32 %v3070_v11, %v910_v51  ;;  %v1076_v57 = vmax.f32 %v1012_v44, 0.0  ;;  %v1078_v58 = vmax.f32 %v1014_v45, 0.0 }
 0x172   : > { %v1079_v55 = vmax.f32 %v1015_v48, 0.0  ;;  %v1081_v56 = vmax.f32 %v1017_v49, 0.0 }
 0x173   : > { %v1080_v59 = vmax.f32 %v1016_v52, 0.0  ;;  %v1082_v60 = vmax.f32 %v1018_v53, 0.0 }
 0x174   : > { %v1109_v61 = vpack.c.bf16 %v1079_v55, %v1075_v0  ;;  %v1125_v63 = vpack.c.bf16 %v1081_v56, %v1077_v54 }
 0x175   : > { %v1110_v3 = vpack.c.bf16 %v1080_v59, %v1076_v57  ;;  %v1126_v4 = vpack.c.bf16 %v1082_v60, %v1078_v58  ;;  %v801_v5 = vpop.f32.mrb[24].mxu0  ;;  %v914_v6 = vpop.f32.mrb[24].mxu1 }
 0x176   : > { %v1019_v7 = vadd.f32 %v3064_v8, %v801_v5  ;;  %v1021_v12 = vadd.f32 %v3066_v9, %v914_v6  ;;  %v803_v13 = vpop.f32.mrb[25].mxu0  ;;  %v916_v14 = vpop.f32.mrb[25].mxu1  ;;  %v1847_v6 = vsub.s32 6, %v3052_v62 }
 0x177   : > { %v1020_v15 = vadd.f32 %v3068_v10, %v803_v13  ;;  %v1022_v16 = vadd.f32 %v3070_v11, %v916_v14  ;;  %v805_v17 = vpop.f32.mrb[26].mxu0  ;;  %v918_v18 = vpop.f32.mrb[26].mxu1  ;;  %1455 = vmatprep.mubr.bf16.mxu0 %v1110_v3  ;;  %1778 = vmatprep.mubr.bf16.mxu1 %v1126_v4  ;;  %v1843_v3 = vsub.s32 2, %v3052_v62 }
 0x178   : > { %v1023_v19 = vadd.f32 %v3064_v8, %v805_v17  ;;  %v1025_v20 = vadd.f32 %v3066_v9, %v918_v18  ;;  %v807_v21 = vpop.f32.mrb[27].mxu0  ;;  %v920_v22 = vpop.f32.mrb[27].mxu1  ;;  %1456 = vmatmul.mubr.bf16.gmra.mrb[52].mxu0 %v1109_v61  ;;  %1779 = vmatmul.mubr.bf16.gmra.mrb[52].mxu1 %v1125_v63  ;;  %v1083_v25 = vmax.f32 %v1019_v7, 0.0  ;;  %v1085_v26 = vmax.f32 %v1021_v12, 0.0 }
 0x179   : > { %v1024_v23 = vadd.f32 %v3068_v10, %v807_v21  ;;  %v1026_v24 = vadd.f32 %v3070_v11, %v920_v22  ;;  %v1084_v29 = vmax.f32 %v1020_v15, 0.0  ;;  %v1086_v30 = vmax.f32 %v1022_v16, 0.0 }
 0x17a   : > { %v1087_v27 = vmax.f32 %v1023_v19, 0.0  ;;  %v1089_v28 = vmax.f32 %v1025_v20, 0.0  ;;  %v1844_v13 = vrot.slane %v3055_v1, %v1843_v3  ;;  %v1979_v15 = vrot.slane %v3057_v2, %v1843_v3 }
 0x17b   : > { %v1088_v31 = vmax.f32 %v1024_v23, 0.0  ;;  %v1090_v32 = vmax.f32 %v1026_v24, 0.0  ;;  %v1848_v17 = vrot.slane %v3055_v1, %v1847_v6  ;;  %v1983_v19 = vrot.slane %v3057_v2, %v1847_v6 }
 0x17c   : > { %v1111_v33 = vpack.c.bf16 %v1087_v27, %v1083_v25  ;;  %v1127_v34 = vpack.c.bf16 %v1089_v28, %v1085_v26  ;;  %v3157_v23 = vrot.slane %v1844_v13, %v1843_v3  ;;  %v3160_v27 = vrot.slane %v1979_v15, %v1843_v3 }
 0x17d   : > { %v1112_v35 = vpack.c.bf16 %v1088_v31, %v1084_v29  ;;  %v1128_v36 = vpack.c.bf16 %v1090_v32, %v1086_v30  ;;  %v811_v37 = vpop.f32.mrb[28].mxu0  ;;  %v924_v38 = vpop.f32.mrb[28].mxu1  ;;  %v3163_v29 = vrot.slane %v1848_v17, %v1843_v3  ;;  %v3166_v31 = vrot.slane %v1983_v19, %v1843_v3 }
 0x17e   : > { %v1027_v39 = vadd.f32 %v3064_v8, %v811_v37  ;;  %v1029_v40 = vadd.f32 %v3066_v9, %v924_v38  ;;  %v813_v41 = vpop.f32.mrb[29].mxu0  ;;  %v926_v42 = vpop.f32.mrb[29].mxu1 }
 0x17f   : > { %v1028_v43 = vadd.f32 %v3068_v10, %v813_v41  ;;  %v1030_v44 = vadd.f32 %v3070_v11, %v926_v42  ;;  %v815_v45 = vpop.f32.mrb[30].mxu0  ;;  %v928_v46 = vpop.f32.mrb[30].mxu1  ;;  %1465 = vmatprep.mubr.bf16.mxu0 %v1112_v35  ;;  %1788 = vmatprep.mubr.bf16.mxu1 %v1128_v36 }
 0x180   : > { %v1031_v47 = vadd.f32 %v3064_v8, %v815_v45  ;;  %v1033_v48 = vadd.f32 %v3066_v9, %v928_v46  ;;  %v817_v49 = vpop.f32.mrb[31].mxu0  ;;  %v930_v50 = vpop.f32.mrb[31].mxu1  ;;  %1466 = vmatmul.mubr.bf16.gmra.mrb[56].mxu0 %v1111_v33  ;;  %1789 = vmatmul.mubr.bf16.gmra.mrb[56].mxu1 %v1127_v34  ;;  %v1091_v53 = vmax.f32 %v1027_v39, 0.0  ;;  %v1093_v0 = vmax.f32 %v1029_v40, 0.0 }
 0x181   : > { %v1032_v51 = vadd.f32 %v3068_v10, %v817_v49  ;;  %v1034_v52 = vadd.f32 %v3070_v11, %v930_v50  ;;  %v1092_v56 = vmax.f32 %v1028_v43, 0.0  ;;  %v1094_v57 = vmax.f32 %v1030_v44, 0.0 }
 0x182   : > { %v1095_v54 = vmax.f32 %v1031_v47, 0.0  ;;  %v1097_v55 = vmax.f32 %v1033_v48, 0.0  ;;  %v1197_v10 = vsub.s32 1, %v3052_v62  ;;  %v1201_v11 = vsub.s32 5, %v3052_v62 }
 0x183   : > { %v1096_v58 = vmax.f32 %v1032_v51, 0.0  ;;  %v1098_v59 = vmax.f32 %v1034_v52, 0.0 }
 0x184   : > { %v1113_v60 = vpack.c.bf16 %v1095_v54, %v1091_v53  ;;  %v1129_v8 = vpack.c.bf16 %v1097_v55, %v1093_v0  ;;  %v1198_v63 = vrot.slane %v3055_v1, %v1197_v10  ;;  %v1521_v4 = vrot.slane %v3057_v2, %v1197_v10 }
 0x185   : > { %v1114_v61 = vpack.c.bf16 %v1096_v58, %v1092_v56  ;;  %v1130_v9 = vpack.c.bf16 %v1098_v59, %v1094_v57  ;;  %v1202_v5 = vrot.slane %v3055_v1, %v1201_v11  ;;  %v1525_v7 = vrot.slane %v3057_v2, %v1201_v11 }
 0x186   : > { %v3144_v12 = vrot.slane %v1198_v63, %v1197_v10  ;;  %v3147_v14 = vrot.slane %v1521_v4, %v1197_v10 }
 0x187   : > { %1475 = vmatprep.mubr.bf16.mxu0 %v1114_v61  ;;  %1798 = vmatprep.mubr.bf16.mxu1 %v1130_v9  ;;  %v3150_v16 = vrot.slane %v1202_v5, %v1197_v10  ;;  %v3153_v18 = vrot.slane %v1525_v7, %v1197_v10 }
 0x188   : > { %1476 = vmatmul.mubr.bf16.gmra.mrb[60].mxu0 %v1113_v60  ;;  %1799 = vmatmul.mubr.bf16.gmra.mrb[60].mxu1 %v1129_v8 }
 0x223   : > { %v1407_v20 = vpop.f32.mrb[32].mxu0  ;;  %v1730_v21 = vpop.f32.mrb[32].mxu1 }
 0x224   : > { %v1408_v22 = vadd.f32 %v1407_v20, %v3144_v12  ;;  %v1731_v24 = vadd.f32 %v1730_v21, %v3147_v14  ;;  %v1409_v25 = vpop.f32.mrb[33].mxu0  ;;  %v1732_v26 = vpop.f32.mrb[33].mxu1 }
 0x225   : > { %v1410_v28 = vadd.f32 %v1409_v25, %v3150_v16  ;;  %v1733_v1 = vadd.f32 %v1732_v26, %v3153_v18  ;;  %v1411_v30 = vpop.f32.mrb[34].mxu0  ;;  %v1734_v2 = vpop.f32.mrb[34].mxu1 }
 0x226   : > { %v1486_v32 = vmax.f32 %v1408_v22, 0.0  ;;  %v1809_v33 = vmax.f32 %v1731_v24, 0.0  ;;  %v1412_v34 = vadd.f32 %v1411_v30, %v3144_v12  ;;  %v1735_v35 = vadd.f32 %v1734_v2, %v3147_v14  ;;  %v1413_v36 = vpop.f32.mrb[35].mxu0  ;;  %v1736_v37 = vpop.f32.mrb[35].mxu1 }
 0x227   : > { %v1487_v38 = vmax.f32 %v1410_v28, 0.0  ;;  %v1810_v39 = vmax.f32 %v1733_v1, 0.0  ;;  %v1414_v40 = vadd.f32 %v1413_v36, %v3150_v16  ;;  %v1737_v41 = vadd.f32 %v1736_v37, %v3153_v18 }
 0x228   : > { %v1859_v42 = vmul.f32 %v3157_v23, %v1486_v32  ;;  %v1488_v43 = vmax.f32 %v1412_v34, 0.0  ;;  %v1811_v44 = vmax.f32 %v1735_v35, 0.0  ;;  %v1994_v45 = vmul.f32 %v3160_v27, %v1809_v33 }
 0x229   : > { %v1860_v46 = vmul.f32 %v3163_v29, %v1487_v38  ;;  %v1489_v47 = vmax.f32 %v1414_v40, 0.0  ;;  %v1812_v48 = vmax.f32 %v1737_v41, 0.0  ;;  %v1995_v49 = vmul.f32 %v3166_v31, %v1810_v39 }
 0x22a   : > { %v1996_v50 = vmul.f32 %v3160_v27, %v1811_v44  ;;  %v1861_v51 = vmul.f32 %v3157_v23, %v1488_v43 }
 0x22b   : > { %v1997_v52 = vmul.f32 %v3166_v31, %v1812_v48  ;;  %v1417_v53 = vpop.f32.mrb[36].mxu0  ;;  %v1740_v0 = vpop.f32.mrb[36].mxu1  ;;  %v2026_v54 = vadd.f32 %v1995_v49, %v1994_v45  ;;  %v1862_v55 = vmul.f32 %v3163_v29, %v1489_v47  ;;  %v1891_v56 = vadd.f32 %v1860_v46, %v1859_v42 }
 0x22c   : > { %v1418_v57 = vadd.f32 %v1417_v53, %v3144_v12  ;;  %v1741_v58 = vadd.f32 %v1740_v0, %v3147_v14  ;;  %v1419_v59 = vpop.f32.mrb[37].mxu0  ;;  %v1742_v60 = vpop.f32.mrb[37].mxu1 }
 0x22d   : > { %v1420_v8 = vadd.f32 %v1419_v59, %v3150_v16  ;;  %v1743_v61 = vadd.f32 %v1742_v60, %v3153_v18  ;;  %v1744_v9 = vpop.f32.mrb[38].mxu1  ;;  %2027 = vadd.xlane.f32.xlu0 %v2026_v54  ;;  %v1421_v10 = vpop.f32.mrb[38].mxu0  ;;  %v1894_v11 = vadd.f32 %v1862_v55, %v1861_v51  ;;  %v2029_v63 = vadd.f32 %v1997_v52, %v1996_v50 }
 0x22e   : > { %v1490_v3 = vmax.f32 %v1418_v57, 0.0  ;;  %v1813_v4 = vmax.f32 %v1741_v58, 0.0  ;;  %v1745_v5 = vadd.f32 %v1744_v9, %v3147_v14  ;;  %v1422_v6 = vadd.f32 %v1421_v10, %v3144_v12  ;;  %v1423_v7 = vpop.f32.mrb[39].mxu0  ;;  %v1746_v13 = vpop.f32.mrb[39].mxu1 }
 0x22f   : > { %v1491_v15 = vmax.f32 %v1420_v8, 0.0  ;;  %v1814_v17 = vmax.f32 %v1743_v61, 0.0  ;;  %v1424_v19 = vadd.f32 %v1423_v7, %v3150_v16  ;;  %v1747_v20 = vadd.f32 %v1746_v13, %v3153_v18  ;;  %1895 = vadd.xlane.f32.xlu1 %v1894_v11 }
 0x230   : > { %v1863_v21 = vmul.f32 %v3157_v23, %v1490_v3  ;;  %v1998_v22 = vmul.f32 %v3160_v27, %v1813_v4  ;;  %v1815_v24 = vmax.f32 %v1745_v5, 0.0  ;;  %v1492_v25 = vmax.f32 %v1422_v6, 0.0 }
 0x231   : > { %v1864_v26 = vmul.f32 %v3163_v29, %v1491_v15  ;;  %v1999_v28 = vmul.f32 %v3166_v31, %v1814_v17  ;;  %v1493_v1 = vmax.f32 %v1424_v19, 0.0  ;;  %v1816_v30 = vmax.f32 %v1747_v20, 0.0  ;;  %1892 = vadd.xlane.f32.xlu0 %v1891_v56 }
 0x232   : > { %v2000_v2 = vmul.f32 %v3160_v27, %v1815_v24  ;;  %v1865_v37 = vmul.f32 %v3157_v23, %v1492_v25 }
 0x233   : > { %v2001_v32 = vmul.f32 %v3166_v31, %v1816_v30  ;;  %v1427_v33 = vpop.f32.mrb[40].mxu0  ;;  %v1750_v34 = vpop.f32.mrb[40].mxu1  ;;  %v2032_v35 = vadd.f32 %v1999_v28, %v1998_v22  ;;  %v1897_v36 = vadd.f32 %v1864_v26, %v1863_v21  ;;  %v1866_v38 = vmul.f32 %v3163_v29, %v1493_v1 }
 0x234   : > { %v1428_v39 = vadd.f32 %v1427_v33, %v3144_v12  ;;  %v1751_v40 = vadd.f32 %v1750_v34, %v3147_v14  ;;  %v1429_v41 = vpop.f32.mrb[41].mxu0  ;;  %v1752_v42 = vpop.f32.mrb[41].mxu1 }
 0x235   : > { %v1430_v43 = vadd.f32 %v1429_v41, %v3150_v16  ;;  %v1753_v44 = vadd.f32 %v1752_v42, %v3153_v18  ;;  %v1431_v45 = vpop.f32.mrb[42].mxu0  ;;  %v1754_v46 = vpop.f32.mrb[42].mxu1  ;;  %2033 = vadd.xlane.f32.xlu1 %v2032_v35  ;;  %2030 = vadd.xlane.f32.xlu0 %v2029_v63  ;;  %v2035_v47 = vadd.f32 %v2001_v32, %v2000_v2 }
 0x236   : > { %v1494_v48 = vmax.f32 %v1428_v39, 0.0  ;;  %v1817_v49 = vmax.f32 %v1751_v40, 0.0  ;;  %v1432_v50 = vadd.f32 %v1431_v45, %v3144_v12  ;;  %v1755_v51 = vadd.f32 %v1754_v46, %v3147_v14  ;;  %v1433_v52 = vpop.f32.mrb[43].mxu0  ;;  %v1756_v53 = vpop.f32.mrb[43].mxu1 }
 0x237   : > { %v1495_v0 = vmax.f32 %v1430_v43, 0.0  ;;  %v1818_v54 = vmax.f32 %v1753_v44, 0.0  ;;  %v1434_v55 = vadd.f32 %v1433_v52, %v3150_v16  ;;  %v1757_v56 = vadd.f32 %v1756_v53, %v3153_v18 }
 0x238   : > { %v1867_v57 = vmul.f32 %v3157_v23, %v1494_v48  ;;  %v2002_v58 = vmul.f32 %v3160_v27, %v1817_v49  ;;  %v1496_v59 = vmax.f32 %v1432_v50, 0.0  ;;  %v1819_v60 = vmax.f32 %v1755_v51, 0.0 }
 0x239   : > { %v1868_v8 = vmul.f32 %v3163_v29, %v1495_v0  ;;  %v2003_v61 = vmul.f32 %v3166_v31, %v1818_v54  ;;  %v1497_v9 = vmax.f32 %v1434_v55, 0.0  ;;  %v1820_v10 = vmax.f32 %v1757_v56, 0.0  ;;  %2036 = vadd.xlane.f32.xlu1 %v2035_v47  ;;  %1898 = vadd.xlane.f32.xlu0 %v1897_v36 }
 0x23a   : > { %v2004_v11 = vmul.f32 %v3160_v27, %v1819_v60  ;;  %v1900_v63 = vadd.f32 %v1866_v38, %v1865_v37  ;;  %v1869_v13 = vmul.f32 %v3157_v23, %v1496_v59 }
 0x23b   : > { %v2005_v3 = vmul.f32 %v3166_v31, %v1820_v10  ;;  %v1437_v4 = vpop.f32.mrb[44].mxu0  ;;  %v1760_v5 = vpop.f32.mrb[44].mxu1  ;;  %v2038_v6 = vadd.f32 %v2003_v61, %v2002_v58  ;;  %v1903_v7 = vadd.f32 %v1868_v8, %v1867_v57  ;;  %v1870_v15 = vmul.f32 %v3163_v29, %v1497_v9 }
 0x23c   : > { %v1438_v17 = vadd.f32 %v1437_v4, %v3144_v12  ;;  %v1761_v19 = vadd.f32 %v1760_v5, %v3147_v14  ;;  %v1439_v20 = vpop.f32.mrb[45].mxu0  ;;  %v1762_v21 = vpop.f32.mrb[45].mxu1 }
 0x23d   : > { %v1440_v22 = vadd.f32 %v1439_v20, %v3150_v16  ;;  %v1763_v24 = vadd.f32 %v1762_v21, %v3153_v18  ;;  %v1441_v25 = vpop.f32.mrb[46].mxu0  ;;  %v1764_v26 = vpop.f32.mrb[46].mxu1  ;;  %1901 = vadd.xlane.f32.xlu1 %v1900_v63  ;;  %2039 = vadd.xlane.f32.xlu0 %v2038_v6  ;;  %v2041_v28 = vadd.f32 %v2005_v3, %v2004_v11 }
 0x23e   : > { %v1498_v1 = vmax.f32 %v1438_v17, 0.0  ;;  %v1821_v30 = vmax.f32 %v1761_v19, 0.0  ;;  %v1442_v2 = vadd.f32 %v1441_v25, %v3144_v12  ;;  %v1765_v32 = vadd.f32 %v1764_v26, %v3147_v14  ;;  %v1443_v33 = vpop.f32.mrb[47].mxu0  ;;  %v1766_v34 = vpop.f32.mrb[47].mxu1 }
 0x23f   : > { %v1499_v35 = vmax.f32 %v1440_v22, 0.0  ;;  %v1822_v36 = vmax.f32 %v1763_v24, 0.0  ;;  %v1444_v37 = vadd.f32 %v1443_v33, %v3150_v16  ;;  %v1767_v38 = vadd.f32 %v1766_v34, %v3153_v18 }
 0x240   : > { %v1871_v39 = vmul.f32 %v3157_v23, %v1498_v1  ;;  %v2006_v40 = vmul.f32 %v3160_v27, %v1821_v30  ;;  %v1500_v41 = vmax.f32 %v1442_v2, 0.0  ;;  %v1823_v42 = vmax.f32 %v1765_v32, 0.0 }
 0x241   : > { %v1872_v43 = vmul.f32 %v3163_v29, %v1499_v35  ;;  %v2007_v44 = vmul.f32 %v3166_v31, %v1822_v36  ;;  %v1501_v45 = vmax.f32 %v1444_v37, 0.0  ;;  %v1824_v46 = vmax.f32 %v1767_v38, 0.0  ;;  %2042 = vadd.xlane.f32.xlu1 %v2041_v28  ;;  %1904 = vadd.xlane.f32.xlu0 %v1903_v7 }
 0x242   : > { %v2008_v47 = vmul.f32 %v3160_v27, %v1823_v42  ;;  %v1906_v48 = vadd.f32 %v1870_v15, %v1869_v13  ;;  %v1873_v0 = vmul.f32 %v3157_v23, %v1500_v41 }
 0x243   : > { %v2009_v49 = vmul.f32 %v3166_v31, %v1824_v46  ;;  %v1447_v50 = vpop.f32.mrb[48].mxu0  ;;  %v1770_v51 = vpop.f32.mrb[48].mxu1  ;;  %v2044_v52 = vadd.f32 %v2007_v44, %v2006_v40  ;;  %v3226_v53 = vadd.f32 %v1872_v43, %v1871_v39  ;;  %v1874_v54 = vmul.f32 %v3163_v29, %v1501_v45 }
 0x244   : > { %v1448_v55 = vadd.f32 %v1447_v50, %v3144_v12  ;;  %v1771_v56 = vadd.f32 %v1770_v51, %v3147_v14  ;;  %v1449_v57 = vpop.f32.mrb[49].mxu0  ;;  %v1772_v58 = vpop.f32.mrb[49].mxu1 }
 0x245   : > { %v1450_v59 = vadd.f32 %v1449_v57, %v3150_v16  ;;  %v1773_v60 = vadd.f32 %v1772_v58, %v3153_v18  ;;  %v1451_v8 = vpop.f32.mrb[50].mxu0  ;;  %v1774_v61 = vpop.f32.mrb[50].mxu1  ;;  %1907 = vadd.xlane.f32.xlu1 %v1906_v48  ;;  %2045 = vadd.xlane.f32.xlu0 %v2044_v52  ;;  %v2047_v9 = vadd.f32 %v2009_v49, %v2008_v47 }
 0x246   : > { %v1502_v10 = vmax.f32 %v1448_v55, 0.0  ;;  %v1825_v11 = vmax.f32 %v1771_v56, 0.0  ;;  %v1452_v63 = vadd.f32 %v1451_v8, %v3144_v12  ;;  %v1775_v3 = vadd.f32 %v1774_v61, %v3147_v14  ;;  %v1453_v4 = vpop.f32.mrb[51].mxu0  ;;  %v1776_v5 = vpop.f32.mrb[51].mxu1 }
 0x247   : > { %v1503_v6 = vmax.f32 %v1450_v59, 0.0  ;;  %v1826_v7 = vmax.f32 %v1773_v60, 0.0  ;;  %v1454_v13 = vadd.f32 %v1453_v4, %v3150_v16  ;;  %v1777_v15 = vadd.f32 %v1776_v5, %v3153_v18 }
 0x248   : > { %v1875_v17 = vmul.f32 %v3157_v23, %v1502_v10  ;;  %v2010_v19 = vmul.f32 %v3160_v27, %v1825_v11  ;;  %v1504_v20 = vmax.f32 %v1452_v63, 0.0  ;;  %v1827_v21 = vmax.f32 %v1775_v3, 0.0 }
 0x249   : > { %v1876_v22 = vmul.f32 %v3163_v29, %v1503_v6  ;;  %v2011_v24 = vmul.f32 %v3166_v31, %v1826_v7  ;;  %v1505_v25 = vmax.f32 %v1454_v13, 0.0  ;;  %v1828_v26 = vmax.f32 %v1777_v15, 0.0  ;;  %2048 = vadd.xlane.f32.xlu1 %v2047_v9 }
 0x24a   : > { %v1877_v28 = vmul.f32 %v3157_v23, %v1504_v20  ;;  %v2012_v1 = vmul.f32 %v3160_v27, %v1827_v21  ;;  %v3244_v30 = vadd.f32 %v1874_v54, %v1873_v0 }
 0x24b   : > { %v1878_v2 = vmul.f32 %v3163_v29, %v1505_v25  ;;  %v2013_v32 = vmul.f32 %v3166_v31, %v1828_v26  ;;  %v1457_v33 = vpop.f32.mrb[52].mxu0  ;;  %v1780_v34 = vpop.f32.mrb[52].mxu1  ;;  %v2050_v35 = vadd.f32 %v2011_v24, %v2010_v19  ;;  %v3248_v36 = vadd.f32 %v1876_v22, %v1875_v17 }
 0x24c   : > { %v1458_v37 = vadd.f32 %v1457_v33, %v3144_v12  ;;  %v1781_v38 = vadd.f32 %v1780_v34, %v3147_v14  ;;  %v1459_v39 = vpop.f32.mrb[53].mxu0  ;;  %v1782_v40 = vpop.f32.mrb[53].mxu1 }
 0x24d   : > { %v1460_v41 = vadd.f32 %v1459_v39, %v3150_v16  ;;  %v1783_v42 = vadd.f32 %v1782_v40, %v3153_v18  ;;  %v1461_v43 = vpop.f32.mrb[54].mxu0  ;;  %v1784_v44 = vpop.f32.mrb[54].mxu1  ;;  %2051 = vadd.xlane.f32.xlu0 %v2050_v35  ;;  %v2053_v45 = vadd.f32 %v2013_v32, %v2012_v1  ;;  %v3254_v46 = vadd.f32 %v1878_v2, %v1877_v28 }
 0x24e   : > { %v1506_v47 = vmax.f32 %v1458_v37, 0.0  ;;  %v1829_v48 = vmax.f32 %v1781_v38, 0.0  ;;  %v1462_v49 = vadd.f32 %v1461_v43, %v3144_v12  ;;  %v1785_v50 = vadd.f32 %v1784_v44, %v3147_v14  ;;  %v1463_v51 = vpop.f32.mrb[55].mxu0  ;;  %v1786_v52 = vpop.f32.mrb[55].mxu1 }
 0x24f   : > { %v1507_v0 = vmax.f32 %v1460_v41, 0.0  ;;  %v1830_v54 = vmax.f32 %v1783_v42, 0.0  ;;  %v1464_v55 = vadd.f32 %v1463_v51, %v3150_v16  ;;  %v1787_v56 = vadd.f32 %v1786_v52, %v3153_v18  ;;  %2054 = vadd.xlane.f32.xlu1 %v2053_v45 }
 0x250   : > { %v1879_v57 = vmul.f32 %v3157_v23, %v1506_v47  ;;  %v2014_v58 = vmul.f32 %v3160_v27, %v1829_v48  ;;  %v1508_v59 = vmax.f32 %v1462_v49, 0.0  ;;  %v1831_v60 = vmax.f32 %v1785_v50, 0.0 }
 0x251   : > { %v1880_v8 = vmul.f32 %v3163_v29, %v1507_v0  ;;  %v2015_v61 = vmul.f32 %v3166_v31, %v1830_v54  ;;  %v1509_v9 = vmax.f32 %v1464_v55, 0.0  ;;  %v1832_v10 = vmax.f32 %v1787_v56, 0.0 }
 0x252   : > { %v1881_v11 = vmul.f32 %v3157_v23, %v1508_v59  ;;  %v2016_v63 = vmul.f32 %v3160_v27, %v1831_v60 }
 0x253   : > { %v1882_v3 = vmul.f32 %v3163_v29, %v1509_v9  ;;  %v2017_v4 = vmul.f32 %v3166_v31, %v1832_v10  ;;  %v1467_v5 = vpop.f32.mrb[56].mxu0  ;;  %v1790_v6 = vpop.f32.mrb[56].mxu1  ;;  %v2056_v7 = vadd.f32 %v2015_v61, %v2014_v58  ;;  %v3268_v13 = vadd.f32 %v1880_v8, %v1879_v57 }
 0x254   : > { %v1468_v15 = vadd.f32 %v1467_v5, %v3144_v12  ;;  %v1791_v17 = vadd.f32 %v1790_v6, %v3147_v14  ;;  %v1469_v19 = vpop.f32.mrb[57].mxu0  ;;  %v1792_v20 = vpop.f32.mrb[57].mxu1 }
 0x255   : > { %v1470_v21 = vadd.f32 %v1469_v19, %v3150_v16  ;;  %v1793_v22 = vadd.f32 %v1792_v20, %v3153_v18  ;;  %v1471_v24 = vpop.f32.mrb[58].mxu0  ;;  %v1794_v25 = vpop.f32.mrb[58].mxu1  ;;  %2057 = vadd.xlane.f32.xlu0 %v2056_v7  ;;  %v2059_v26 = vadd.f32 %v2017_v4, %v2016_v63  ;;  %v3274_v28 = vadd.f32 %v1882_v3, %v1881_v11 }
 0x256   : > { %v1510_v1 = vmax.f32 %v1468_v15, 0.0  ;;  %v1833_v2 = vmax.f32 %v1791_v17, 0.0  ;;  %v1472_v32 = vadd.f32 %v1471_v24, %v3144_v12  ;;  %v1795_v33 = vadd.f32 %v1794_v25, %v3147_v14  ;;  %v1473_v34 = vpop.f32.mrb[59].mxu0  ;;  %v1796_v35 = vpop.f32.mrb[59].mxu1 }
 0x257   : > { %v1511_v37 = vmax.f32 %v1470_v21, 0.0  ;;  %v1834_v38 = vmax.f32 %v1793_v22, 0.0  ;;  %v1474_v39 = vadd.f32 %v1473_v34, %v3150_v16  ;;  %v1797_v40 = vadd.f32 %v1796_v35, %v3153_v18  ;;  %2060 = vadd.xlane.f32.xlu1 %v2059_v26 }
 0x258   : > { %v1883_v41 = vmul.f32 %v3157_v23, %v1510_v1  ;;  %v2018_v42 = vmul.f32 %v3160_v27, %v1833_v2  ;;  %v1512_v43 = vmax.f32 %v1472_v32, 0.0  ;;  %v1835_v44 = vmax.f32 %v1795_v33, 0.0 }
 0x259   : > { %v1884_v45 = vmul.f32 %v3163_v29, %v1511_v37  ;;  %v2019_v47 = vmul.f32 %v3166_v31, %v1834_v38  ;;  %v1513_v48 = vmax.f32 %v1474_v39, 0.0  ;;  %v1836_v49 = vmax.f32 %v1797_v40, 0.0 }
 0x25a   : > { %v1885_v50 = vmul.f32 %v3157_v23, %v1512_v43  ;;  %v2020_v51 = vmul.f32 %v3160_v27, %v1835_v44 }
 0x25b   : > { %v1886_v52 = vmul.f32 %v3163_v29, %v1513_v48  ;;  %v2021_v0 = vmul.f32 %v3166_v31, %v1836_v49  ;;  %v1477_v54 = vpop.f32.mrb[60].mxu0  ;;  %v1800_v55 = vpop.f32.mrb[60].mxu1  ;;  %v2062_v56 = vadd.f32 %v2019_v47, %v2018_v42  ;;  %v1927_v57 = vadd.f32 %v1884_v45, %v1883_v41 }
 0x25c   : > { %v1478_v58 = vadd.f32 %v1477_v54, %v3144_v12  ;;  %v1801_v59 = vadd.f32 %v1800_v55, %v3147_v14  ;;  %v1479_v60 = vpop.f32.mrb[61].mxu0  ;;  %v1802_v8 = vpop.f32.mrb[61].mxu1 }
 0x25d   : > { %v1480_v61 = vadd.f32 %v1479_v60, %v3150_v16  ;;  %v1803_v9 = vadd.f32 %v1802_v8, %v3153_v18  ;;  %v1804_v10 = vpop.f32.mrb[62].mxu1  ;;  %2063 = vadd.xlane.f32.xlu0 %v2062_v56  ;;  %v1481_v11 = vpop.f32.mrb[62].mxu0  ;;  %v2065_v63 = vadd.f32 %v2021_v0, %v2020_v51  ;;  %v1930_v3 = vadd.f32 %v1886_v52, %v1885_v50 }
 0x25e   : > { %v1514_v4 = vmax.f32 %v1478_v58, 0.0  ;;  %v1837_v5 = vmax.f32 %v1801_v59, 0.0  ;;  %v1805_v6 = vadd.f32 %v1804_v10, %v3147_v14  ;;  %v1482_v7 = vadd.f32 %v1481_v11, %v3144_v12  ;;  %v1483_v15 = vpop.f32.mrb[63].mxu0  ;;  %v1806_v17 = vpop.f32.mrb[63].mxu1 }
 0x25f   : > { %v1515_v19 = vmax.f32 %v1480_v61, 0.0  ;;  %v1838_v20 = vmax.f32 %v1803_v9, 0.0  ;;  %v1484_v21 = vadd.f32 %v1483_v15, %v3150_v16  ;;  %v1807_v22 = vadd.f32 %v1806_v17, %v3153_v18  ;;  %2066 = vadd.xlane.f32.xlu1 %v2065_v63 }
 0x260   : > { %v1887_v24 = vmul.f32 %v3157_v23, %v1514_v4  ;;  %v2022_v25 = vmul.f32 %v3160_v27, %v1837_v5  ;;  %v1839_v26 = vmax.f32 %v1805_v6, 0.0  ;;  %v1516_v1 = vmax.f32 %v1482_v7, 0.0 }
 0x261   : > { %v1888_v2 = vmul.f32 %v3163_v29, %v1515_v19  ;;  %v2023_v14 = vmul.f32 %v3166_v31, %v1838_v20  ;;  %v1517_v12 = vmax.f32 %v1484_v21, 0.0  ;;  %v1840_v32 = vmax.f32 %v1807_v22, 0.0 }
 0x262   : > { %v2024_v33 = vmul.f32 %v3160_v27, %v1839_v26  ;;  %v1889_v34 = vmul.f32 %v3157_v23, %v1516_v1  ;;  %v1941_v23 = vsub.s32 3, %v3052_v62  ;;  %v2598_v27 = vld [vmem:[#allocation2] sm:$0xff] }
 0x263   : > { %v1890_v16 = vmul.f32 %v3163_v29, %v1517_v12  ;;  %v2025_v18 = vmul.f32 %v3166_v31, %v1840_v32  ;;  %1913 = vadd.xlane.f32.xlu1 %v3244_v30  ;;  %v2068_v35 = vadd.f32 %v2023_v14, %v2022_v25  ;;  %v1933_v37 = vadd.f32 %v1888_v2, %v1887_v24 }
 0x264   : > { %v3311_v29 = vrot.slane %v2598_v27, %v1941_v23 }
 0x265   : > { %2069 = vadd.xlane.f32.xlu0 %v2068_v35  ;;  %v2071_v38 = vadd.f32 %v2025_v18, %v2024_v33  ;;  %v1936_v39 = vadd.f32 %v1890_v16, %v1889_v34 }
 0x267   : > { %1919 = vadd.xlane.f32.xlu1 %v3254_v46 }
 0x269   : > { %1910 = vadd.xlane.f32.xlu0 %v3226_v53 }
 0x26b   : > { %1925 = vadd.xlane.f32.xlu1 %v3274_v28 }
 0x26d   : > { %1916 = vadd.xlane.f32.xlu0 %v3248_v36 }
 0x26f   : > { %2072 = vadd.xlane.f32.xlu1 %v2071_v38 }
 0x271   : > { %1922 = vadd.xlane.f32.xlu0 %v3268_v13 }
 0x273   : > { %1931 = vadd.xlane.f32.xlu1 %v1930_v3 }
 0x275   : > { %1928 = vadd.xlane.f32.xlu0 %v1927_v57 }
 0x277   : > { %1937 = vadd.xlane.f32.xlu1 %v1936_v39 }
 0x279   : > { %1934 = vadd.xlane.f32.xlu0 %v1933_v37 }
 0x2ba   : > { %v2028_v31 = vpop.xlane.xlu0 %2027 }
 0x2bb   : > { %v2074_v30 = vadd.f32 %v2028_v31, %v3311_v29 }
 0x2bc   : > { %v1896_v53 = vpop.xlane.xlu1 %1895 }
 0x2bd   : > { %v1944_v36 = vadd.f32 %v3311_v29, %v1896_v53  ;;  %2106 = vrot.lane.b32.xlu0 %v2074_v30, %s2641_s28 }
 0x2be   : > { %v1893_v62 = vpop.xlane.xlu0 %1892 }
 0x2bf   : > { %1961 = vst.msk [vmem:[%s3318_s27 + $0x8] sm:$0xff] %vm1959_vm3, %v1944_v36  ;;  %v1943_v46 = vadd.f32 %v3311_v29, %v1893_v62 }
 0x2c1   : > { %1960 = vst.msk [vmem:[%s3318_s27] sm:$0xff] %vm1959_vm3, %v1943_v46 }
 0x2c2   : > { %v2034_v13 = vpop.xlane.xlu1 %2033  ;;  %v2031_v28 = vpop.xlane.xlu0 %2030 }
 0x2c3   : > { %v2075_v40 = vadd.f32 %v2031_v28, %v3311_v29  ;;  %v2076_v43 = vadd.f32 %v2034_v13, %v3311_v29 }
 0x2c5   : > { %2108 = vrot.lane.b32.xlu1 %v2075_v40, %s2641_s28 }
 0x2c6   : > { %v2037_v41 = vpop.xlane.xlu1 %2036  ;;  %v1899_v42 = vpop.xlane.xlu0 %1898 }
 0x2c7   : > { %v1945_v44 = vadd.f32 %v3311_v29, %v1899_v42  ;;  %v2077_v48 = vadd.f32 %v2037_v41, %v3311_v29 }
 0x2c9   : > { %1962 = vst.msk [vmem:[%s3318_s27 + $0x10] sm:$0xff] %vm1959_vm3, %v1945_v44  ;;  %2110 = vrot.lane.b32.xlu1 %v2076_v43, %s2641_s28 }
 0x2ca   : > { %v1902_v45 = vpop.xlane.xlu1 %1901  ;;  %v2040_v47 = vpop.xlane.xlu0 %2039 }
 0x2cb   : > { %v1946_v49 = vadd.f32 %v3311_v29, %v1902_v45  ;;  %v2078_v50 = vadd.f32 %v2040_v47, %v3311_v29 }
 0x2cd   : > { %1963 = vst.msk [vmem:[%s3318_s27 + $0x18] sm:$0xff] %vm1959_vm3, %v1946_v49  ;;  %2112 = vrot.lane.b32.xlu1 %v2077_v48, %s2641_s28  ;;  %2114 = vrot.lane.b32.xlu0 %v2078_v50, %s2641_s28 }
 0x2ce   : > { %v2043_v51 = vpop.xlane.xlu1 %2042  ;;  %v1905_v52 = vpop.xlane.xlu0 %1904 }
 0x2cf   : > { %v2079_v0 = vadd.f32 %v2043_v51, %v3311_v29  ;;  %v1947_v54 = vadd.f32 %v3311_v29, %v1905_v52 }
 0x2d1   : > { %1964 = vst.msk [vmem:[%s3318_s27 + $0x20] sm:$0xff] %vm1959_vm3, %v1947_v54  ;;  %2116 = vrot.lane.b32.xlu1 %v2079_v0, %s2641_s28 }
 0x2d2   : > { %v1908_v55 = vpop.xlane.xlu1 %1907  ;;  %v2046_v56 = vpop.xlane.xlu0 %2045 }
 0x2d3   : > { %v1948_v57 = vadd.f32 %v3311_v29, %v1908_v55  ;;  %v2080_v58 = vadd.f32 %v2046_v56, %v3311_v29 }
 0x2d5   : > { %1965 = vst.msk [vmem:[%s3318_s27 + $0x28] sm:$0xff] %vm1959_vm3, %v1948_v57  ;;  %2118 = vrot.lane.b32.xlu0 %v2080_v58, %s2641_s28 }
 0x2d6   : > { %v2049_v59 = vpop.xlane.xlu1 %2048 }
 0x2d7   : > { %v2081_v60 = vadd.f32 %v2049_v59, %v3311_v29 }
 0x2d9   : > { %2120 = vrot.lane.b32.xlu1 %v2081_v60, %s2641_s28 }
 0x2da   : > { %v2052_v8 = vpop.xlane.xlu0 %2051 }
 0x2db   : > { %v2082_v61 = vadd.f32 %v2052_v8, %v3311_v29 }
 0x2dc   : > { %v2055_v9 = vpop.xlane.xlu1 %2054 }
 0x2dd   : > { %v2083_v10 = vadd.f32 %v2055_v9, %v3311_v29  ;;  %2122 = vrot.lane.b32.xlu0 %v2082_v61, %s2641_s28 }
 0x2df   : > { %2124 = vrot.lane.b32.xlu1 %v2083_v10, %s2641_s28 }
 0x2e2   : > { %v2058_v11 = vpop.xlane.xlu0 %2057 }
 0x2e3   : > { %v2084_v63 = vadd.f32 %v2058_v11, %v3311_v29 }
 0x2e4   : > { %v2061_v3 = vpop.xlane.xlu1 %2060 }
 0x2e5   : > { %v2085_v4 = vadd.f32 %v2061_v3, %v3311_v29  ;;  %2126 = vrot.lane.b32.xlu0 %v2084_v63, %s2641_s28 }
 0x2e7   : > { %2128 = vrot.lane.b32.xlu1 %v2085_v4, %s2641_s28 }
 0x2ea   : > { %v2064_v5 = vpop.xlane.xlu0 %2063 }
 0x2eb   : > { %v2086_v6 = vadd.f32 %v2064_v5, %v3311_v29 }
 0x2ec   : > { %v2067_v7 = vpop.xlane.xlu1 %2066 }
 0x2ed   : > { %v2087_v15 = vadd.f32 %v2067_v7, %v3311_v29  ;;  %2130 = vrot.lane.b32.xlu0 %v2086_v6, %s2641_s28 }
 0x2ef   : > { %2132 = vrot.lane.b32.xlu1 %v2087_v15, %s2641_s28 }
 0x2f0   : > { %v1914_v17 = vpop.xlane.xlu1 %1913 }
 0x2f1   : > { %v1950_v19 = vadd.f32 %v3311_v29, %v1914_v17 }
 0x2f2   : > { %v2070_v20 = vpop.xlane.xlu0 %2069 }
 0x2f3   : > { %1967 = vst.msk [vmem:[%s3318_s27 + $0x38] sm:$0xff] %vm1959_vm3, %v1950_v19  ;;  %v2088_v21 = vadd.f32 %v2070_v20, %v3311_v29 }
 0x2f4   : > { %v1920_v22 = vpop.xlane.xlu1 %1919 }
 0x2f5   : > { %v1952_v24 = vadd.f32 %v3311_v29, %v1920_v22  ;;  %2134 = vrot.lane.b32.xlu0 %v2088_v21, %s2641_s28 }
 0x2f6   : > { %v1911_v25 = vpop.xlane.xlu0 %1910 }
 0x2f7   : > { %1969 = vst.msk [vmem:[%s3318_s27 + $0x48] sm:$0xff] %vm1959_vm3, %v1952_v24  ;;  %v1949_v26 = vadd.f32 %v3311_v29, %v1911_v25 }
 0x2f8   : > { %v1926_v1 = vpop.xlane.xlu1 %1925 }
 0x2f9   : > { %1966 = vst.msk [vmem:[%s3318_s27 + $0x30] sm:$0xff] %vm1959_vm3, %v1949_v26  ;;  %v1954_v2 = vadd.f32 %v3311_v29, %v1926_v1 }
 0x2fa   : > { %v1917_v14 = vpop.xlane.xlu0 %1916 }
 0x2fb   : > { %1971 = vst.msk [vmem:[%s3318_s27 + $0x58] sm:$0xff] %vm1959_vm3, %v1954_v2  ;;  %v1951_v12 = vadd.f32 %v3311_v29, %v1917_v14 }
 0x2fc   : > { %v2073_v32 = vpop.xlane.xlu1 %2072 }
 0x2fd   : > { %1968 = vst.msk [vmem:[%s3318_s27 + $0x40] sm:$0xff] %vm1959_vm3, %v1951_v12  ;;  %v2089_v33 = vadd.f32 %v2073_v32, %v3311_v29 }
 0x2fe   : > { %v1923_v34 = vpop.xlane.xlu0 %1922 }
 0x2ff   : > { %v1953_v16 = vadd.f32 %v3311_v29, %v1923_v34  ;;  %2136 = vrot.lane.b32.xlu1 %v2089_v33, %s2641_s28 }
 0x300   : > { %v1932_v18 = vpop.xlane.xlu1 %1931 }
 0x301   : > { %1970 = vst.msk [vmem:[%s3318_s27 + $0x50] sm:$0xff] %vm1959_vm3, %v1953_v16  ;;  %v1956_v35 = vadd.f32 %v3311_v29, %v1932_v18 }
 0x302   : > { %v1929_v37 = vpop.xlane.xlu0 %1928 }
 0x303   : > { %1973 = vst.msk [vmem:[%s3318_s27 + $0x68] sm:$0xff] %vm1959_vm3, %v1956_v35  ;;  %v1955_v38 = vadd.f32 %v3311_v29, %v1929_v37 }
 0x304   : > { %v1938_v39 = vpop.xlane.xlu1 %1937 }
 0x305   : > { %1972 = vst.msk [vmem:[%s3318_s27 + $0x60] sm:$0xff] %vm1959_vm3, %v1955_v38  ;;  %v1958_v23 = vadd.f32 %v3311_v29, %v1938_v39 }
 0x306   : > { %v1935_v27 = vpop.xlane.xlu0 %1934 }
 0x307   : > { %1975 = vst.msk [vmem:[%s3318_s27 + $0x78] sm:$0xff] %vm1959_vm3, %v1958_v23  ;;  %v1957_v31 = vadd.f32 %v3311_v29, %v1935_v27 }
 0x309   : > { %1974 = vst.msk [vmem:[%s3318_s27 + $0x70] sm:$0xff] %vm1959_vm3, %v1957_v31 }
 0x32f   : > { %v2107_v30 = vpop.permute.xlu0 %2106 }
 0x330   : > { %2154 = vst.msk [vmem:[%s3403_s30] sm:$0xff] %vm1959_vm3, %v2107_v30 }
 0x337   : > { %v2109_v29 = vpop.permute.xlu1 %2108 }
 0x338   : > { %2155 = vst.msk [vmem:[%s3403_s30 + $0x8] sm:$0xff] %vm1959_vm3, %v2109_v29 }
 0x33b   : > { %v2111_v53 = vpop.permute.xlu1 %2110 }
 0x33c   : > { %2156 = vst.msk [vmem:[%s3403_s30 + $0x10] sm:$0xff] %vm1959_vm3, %v2111_v53 }
 0x33f   : > { %v2113_v36 = vpop.permute.xlu1 %2112  ;;  %v2115_v62 = vpop.permute.xlu0 %2114 }
 0x340   : > { %2157 = vst.msk [vmem:[%s3403_s30 + $0x18] sm:$0xff] %vm1959_vm3, %v2113_v36  ;;  %2158 = vst.msk [vmem:[%s3403_s30 + $0x20] sm:$0xff] %vm1959_vm3, %v2115_v62 }
 0x343   : > { %v2117_v46 = vpop.permute.xlu1 %2116 }
 0x344   : > { %2159 = vst.msk [vmem:[%s3403_s30 + $0x28] sm:$0xff] %vm1959_vm3, %v2117_v46 }
 0x347   : > { %v2119_v13 = vpop.permute.xlu0 %2118 }
 0x348   : > { %2160 = vst.msk [vmem:[%s3403_s30 + $0x30] sm:$0xff] %vm1959_vm3, %v2119_v13 }
 0x34b   : > { %v2121_v28 = vpop.permute.xlu1 %2120 }
 0x34c   : > { %2161 = vst.msk [vmem:[%s3403_s30 + $0x38] sm:$0xff] %vm1959_vm3, %v2121_v28 }
 0x34f   : > { %v2123_v40 = vpop.permute.xlu0 %2122 }
 0x350   : > { %2162 = vst.msk [vmem:[%s3403_s30 + $0x40] sm:$0xff] %vm1959_vm3, %v2123_v40 }
 0x351   : > { %v2125_v41 = vpop.permute.xlu1 %2124 }
 0x352   : > { %2163 = vst.msk [vmem:[%s3403_s30 + $0x48] sm:$0xff] %vm1959_vm3, %v2125_v41 }
 0x357   : > { %v2127_v42 = vpop.permute.xlu0 %2126 }
 0x358   : > { %2164 = vst.msk [vmem:[%s3403_s30 + $0x50] sm:$0xff] %vm1959_vm3, %v2127_v42 }
 0x359   : > { %v2129_v43 = vpop.permute.xlu1 %2128 }
 0x35a   : > { %2165 = vst.msk [vmem:[%s3403_s30 + $0x58] sm:$0xff] %vm1959_vm3, %v2129_v43 }
 0x35f   : > { %v2131_v44 = vpop.permute.xlu0 %2130 }
 0x360   : > { %2166 = vst.msk [vmem:[%s3403_s30 + $0x60] sm:$0xff] %vm1959_vm3, %v2131_v44 }
 0x361   : > { %v2133_v45 = vpop.permute.xlu1 %2132 }
 0x362   : > { %2167 = vst.msk [vmem:[%s3403_s30 + $0x68] sm:$0xff] %vm1959_vm3, %v2133_v45 }
 0x367   : > { %v2135_v47 = vpop.permute.xlu0 %2134 }
 0x368   : > { %2168 = vst.msk [vmem:[%s3403_s30 + $0x70] sm:$0xff] %vm1959_vm3, %v2135_v47 }
 0x371   : > { %v2137_v48 = vpop.permute.xlu1 %2136 }
 0x372   : > { %2169 = vst.msk [vmem:[%s3403_s30 + $0x78] sm:$0xff] %vm1959_vm3, %v2137_v48 }
 0x373 PF: > { %s19_s24 = sadd.s32 1, %s2637_s24  }
 0x374   : > { %p16_p3 = scmp.ge.s32.totalorder %s19_s24, 4  }
 0x376   :  { %18 = sbr.rel (!%p16_p3) target bundleno = 1 (0x1), region = 94 }
 0x37d   :  { %2209 = vsyncpa [#allocation3], 1 }
 0x37e   :  { %2211 = vsyncpa [#allocation3 + $0x1], 1 }

</bundles_post_ra>
